<compile_context>
chip_gen: v7x
topology: tpu7x:2x2x1
jax: 0.10.0
libtpu: 0.0.40
codegen_flags: <defaults>
</compile_context>

<pallas_src>
import functools
import math

import jax
import jax.numpy as jnp
import numpy as np
from jax.experimental import pallas as pl
from jax.experimental.pallas import tpu as pltpu

EPS = 1e-6  # module's `eps` buffer


def _softplus(x):
    # matches torch.nn.functional.softplus(beta=1, threshold=20); wrapper/reference use
    return jnp.where(x > 20.0, x, jnp.log1p(jnp.exp(jnp.minimum(x, 20.0))))


def _softplus_k(x):
    # in-kernel variant: plain log/exp (robust Mosaic lowering, works in bf16 on v6e/v7x)
    one = jnp.asarray(1.0, x.dtype)
    return jnp.where(x > 20.0, x, jnp.log(one + jnp.exp(jnp.minimum(x, 20.0))))


def _cdiv(a, b):
    return (a + b - 1) // b


def _round_up(a, b):
    return _cdiv(a, b) * b


def _device_kind():
    try:
        return jax.devices()[0].device_kind.lower()
    except Exception:
        return ""


def hull_kernel(x_ref, gw_ref, gb_ref, w0s_ref, w1s_ref, b1c_ref, ob_ref,
                out_ref, *, petals, dim, kind, act_bf16):
    """One tile of tokens through the log-space ICNN hull + temperature LSE."""
    x = x_ref[...]                                                # (tm, D) f32

    # gate_layer (Linear(D,1)) -> softplus -> log-sigmoid-style gate
    gate_lin = jnp.sum(x * gw_ref[...], axis=-1, keepdims=True) + gb_ref[...]
    gate_pre = _softplus_k(gate_lin)
    log_gate = -_softplus_k(-gate_pre)                            # (tm, 1)
    xg = x + log_gate                                             # (tm, D)

    # per-token temperature
    r = jnp.sqrt(jnp.mean(xg * xg, axis=-1, keepdims=True) + EPS)
    tau_v = jnp.minimum(jnp.exp(0.30343 * r + 0.22159), 20.0)     # (tm, 1)
    inv_tau = pl.reciprocal(tau_v, approx=True)                   # (tm, 1)

    # layer 0, all petals in ONE MXU dot; g0 folded into W0s, exp(log(.)) folded away.
    z0 = jnp.dot(xg.astype(jnp.bfloat16), w0s_ref[...],
                 preferred_element_type=jnp.float32)              # (tm, pd1_pad)
    if act_bf16:
        # v6e/v7x: bf16 EUP is ~2x throughput; value is truncated to bf16 for the
        # MXU anyway, so added error is of the order of the existing cast.
        sp0 = _softplus_k(z0.astype(jnp.bfloat16))
        h = jnp.maximum(sp0, jnp.asarray(EPS, jnp.bfloat16))      # bf16 into the dot
    else:
        h = jnp.maximum(_softplus_k(z0), EPS).astype(jnp.bfloat16)

    # fused layer 1: (h @ w1^T)*g1 + h @ z_w + bias_1*g1 == h @ W1s + b1c (exact),
    # block-diagonal over petals so one dot handles all of them.
    z1_pre = jnp.dot(h, w1s_ref[...],
                     preferred_element_type=jnp.float32) + b1c_ref[...]
    z1 = jnp.log(_softplus_k(z1_pre) + EPS) + ob_ref[...]         # (tm, pD_pad)
    scaled = z1 * tau_v                                           # (tm, pD_pad)

    # log-sum-exp over petals. Max over the P real slices, then ONE lane-dense
    # exp pass over the full padded width (pad lanes see `scaled - 0` <= ~0, harmless).
    pd = petals * dim
    m = scaled[:, 0:dim]
    for p in range(1, petals):
        m = jnp.maximum(m, scaled[:, p * dim:(p + 1) * dim])
    pad = scaled.shape[-1] - pd
    parts = [m] * petals
    if pad:
        parts.append(jnp.zeros((m.shape[0], pad), m.dtype))
    e = jnp.exp(scaled - jnp.concatenate(parts, axis=-1))         # single wide exp
    ssum = e[:, 0:dim]
    for p in range(1, petals):
        ssum = ssum + e[:, p * dim:(p + 1) * dim]
    res = (m + jnp.log(ssum)) * inv_tau                           # (tm, D)

    if kind == 0:
        # scalar head: reduce over D in-kernel -> saves a full (N, D) HBM round trip
        out_ref[...] = jnp.mean(res, axis=-1, keepdims=True).astype(out_ref.dtype)
    else:
        # TODO(synk): pack 4 tokens/row for a 128-lane output slab once the
        # (tm, D) -> (tm/4, 4*D) in-kernel relayout is verified on all targets.
        out_ref[...] = res.astype(out_ref.dtype)


def init_params(key, dim, petals):
    """Deterministic stand-in for LogBatchedHull.__init__ parameter shapes."""
    D, P = dim, petals
    d1, d2 = 2 * D, D
    ks = jax.random.split(key, 5)
    mean0 = math.log(math.sqrt(2.0 / D))
    mean1 = math.log(math.sqrt(2.0 / d1))
    weight_raw_0 = mean0 + 0.2 * jax.random.normal(ks[0], (P, d1, D), jnp.float32)
    weight_raw_1 = mean1 + 0.2 * jax.random.normal(ks[1], (P, d2, d1), jnp.float32)
    bound_z = 1.0 / math.sqrt(d1 * d2)       # kaiming_uniform(a=sqrt(5)) bound
    z_weight = jax.random.uniform(ks[2], (P, d1, d2), jnp.float32, -bound_z, bound_z)
    bound_g = 1.0 / math.sqrt(D)             # nn.Linear default init bound
    gate_w = jax.random.uniform(ks[3], (1, D), jnp.float32, -bound_g, bound_g)
    gate_b = jax.random.uniform(ks[4], (1,), jnp.float32, -bound_g, bound_g)
    return dict(
        weight_raw_0=weight_raw_0,
        weight_raw_1=weight_raw_1,
        z_weight=z_weight,
        gate_raw_0=jnp.full((P,), -3.0, jnp.float32),
        gate_raw_1=jnp.full((P,), -3.0, jnp.float32),
        bias_1=jnp.zeros((P, D), jnp.float32),
        output_bias=jnp.zeros((P, D), jnp.float32),
        gate_w=gate_w,
        gate_b=gate_b,
        # bias_0 / noise_scale / creative exist in the module but are unused in forward
    )


def fold_params(params, dim, petals):
    """Hoisted parameter folding — run once per parameter update, not per forward."""
    D, P = dim, petals
    d1 = 2 * D
    w0 = _softplus(params["weight_raw_0"]) ** 2                   # (P, d1, D)
    w1 = _softplus(params["weight_raw_1"]) ** 2                   # (P, D, d1)
    g0 = jax.nn.sigmoid(params["gate_raw_0"]).reshape(P, 1, 1)
    g1 = jax.nn.sigmoid(params["gate_raw_1"]).reshape(P, 1, 1)

    # layer-0: fold g0 into the transposed weight, stack petals on the output axis.
    w0t_g = jnp.transpose(w0, (0, 2, 1)) * g0                     # (P, D, d1)
    w0s = jnp.transpose(w0t_g, (1, 0, 2)).reshape(D, P * d1)      # (D, P*d1)

    # layer-1: exact fusion of gated linear + convex residual, block-diagonal.
    w1c = jnp.transpose(w1, (0, 2, 1)) * g1 + params["z_weight"]  # (P, d1, D)
    eye_p = jnp.eye(P, dtype=jnp.float32)
    w1s = (eye_p[:, None, :, None] * w1c[:, :, None, :]).reshape(P * d1, P * D)

    b1c = (params["bias_1"] * g1[:, :, 0]).reshape(1, P * D)      # bias_1 * g1
    ob = params["output_bias"].reshape(1, P * D)

    # zero-pad fused operands to lane multiples (exact no-op math, lane-dense vregs)
    pd1_pad = _round_up(P * d1, 128)
    pD_pad = _round_up(P * D, 128)
    w0s = jnp.pad(w0s, ((0, 0), (0, pd1_pad - P * d1))).astype(jnp.bfloat16)
    w1s = jnp.pad(w1s, ((0, pd1_pad - P * d1), (0, pD_pad - P * D))).astype(jnp.bfloat16)
    b1c = jnp.pad(b1c, ((0, 0), (0, pD_pad - P * D))).astype(jnp.float32)
    ob = jnp.pad(ob, ((0, 0), (0, pD_pad - P * D))).astype(jnp.float32)

    return dict(
        w0s=w0s, w1s=w1s, b1c=b1c, ob=ob,
        gw=params["gate_w"].astype(jnp.float32).reshape(1, D),
        gb=params["gate_b"].astype(jnp.float32).reshape(1, 1),
        dim=D, petals=P, pd1_pad=pd1_pad, pD_pad=pD_pad,
    )


def log_batched_hull(x, folded, kind):
    B, H, S, D = x.shape
    assert D == folded["dim"]
    P = folded["petals"]
    pd1_pad, pD_pad = folded["pd1_pad"], folded["pD_pad"]
    N = B * H * S

    dev = _device_kind()
    is_v7 = ("v7" in dev) or ("tpu7" in dev)
    act_bf16 = is_v7 or ("v6" in dev)          # bf16 EUP path only where it helps
    num_cores = 2 if is_v7 else 1              # split tokens only for 2-TC chips

    x_flat = x.reshape(N, D).astype(jnp.float32)

    # tile sizing: largest tile inside a conservative VMEM budget (fits the
    # smallest default scoped VMEM); only split the token axis on v7x.
    TM_MAX = 1024
    per_tok_bytes = 4 * (2 * D + 2 * pd1_pad + 4 * pD_pad + D)
    fixed_bytes = 2 * 2 * (D * pd1_pad + pd1_pad * pD_pad) + (1 << 16)
    budget = 8 << 20
    tm = TM_MAX
    while tm > 8 and fixed_bytes + tm * per_tok_bytes > budget:
        tm //= 2
    tm = max(8, min(tm, _round_up(_cdiv(N, num_cores), 8)))
    num_blocks = _cdiv(N, tm)
    if num_cores > 1 and num_blocks % num_cores:
        num_blocks += num_cores - (num_blocks % num_cores)
        tm = max(8, _round_up(_cdiv(N, num_blocks), 8))
        num_blocks = _cdiv(N, tm)
    n_pad = num_blocks * tm
    if n_pad != N:
        x_flat = jnp.pad(x_flat, ((0, n_pad - N), (0, 0)))

    out_cols = 1 if kind == 0 else D
    out = pl.pallas_call(
        functools.partial(hull_kernel, petals=P, dim=D, kind=kind, act_bf16=act_bf16),
        out_shape=jax.ShapeDtypeStruct((n_pad, out_cols), jnp.float32),
        grid_spec=pltpu.PrefetchScalarGridSpec(
            num_scalar_prefetch=0,
            grid=(num_blocks,),
            in_specs=[
                pl.BlockSpec((tm, D), lambda i: (i, 0)),            # x tile
                pl.BlockSpec((1, D), lambda i: (0, 0)),             # gate_w
                pl.BlockSpec((1, 1), lambda i: (0, 0)),             # gate_b
                pl.BlockSpec((D, pd1_pad), lambda i: (0, 0)),       # stacked W0 (g0 folded)
                pl.BlockSpec((pd1_pad, pD_pad), lambda i: (0, 0)),  # block-diag fused W1
                pl.BlockSpec((1, pD_pad), lambda i: (0, 0)),        # fused bias_1*g1
                pl.BlockSpec((1, pD_pad), lambda i: (0, 0)),        # output_bias
            ],
            out_specs=pl.BlockSpec((tm, out_cols), lambda i: (i, 0)),
        ),
        compiler_params=pltpu.CompilerParams(
            dimension_semantics=("parallel",)),
    )(x_flat, folded["gw"], folded["gb"], folded["w0s"], folded["w1s"],
      folded["b1c"], folded["ob"])

    if kind == 0:
        return out[:N, 0].reshape(B, H, S)                 # (B, H, S)
    return out[:N].reshape(B, H, S, D)                     # (B, H, S, D)


def reference_forward(x, params, kind):
    """Pure-JAX mirror of the PyTorch forward (for verification)."""
    B, H, S, D = x.shape
    P = params["weight_raw_0"].shape[0]
    gate_lin = x @ params["gate_w"].T + params["gate_b"]          # (B,H,S,1)
    gate_pre = _softplus(gate_lin)
    log_gate = -_softplus(-gate_pre)
    xg = x + log_gate
    r = jnp.sqrt(jnp.mean(xg ** 2, axis=-1, keepdims=True) + EPS)
    tau = jnp.minimum(jnp.exp(0.30343 * r + 0.22159), 20.0)
    x_flat = xg.reshape(B * H * S, D)
    w0 = _softplus(params["weight_raw_0"]) ** 2
    g0 = jax.nn.sigmoid(params["gate_raw_0"]).reshape(P, 1, 1)
    x0 = jnp.broadcast_to(x_flat[None], (P,) + x_flat.shape)
    z0 = jnp.log(jnp.maximum(_softplus(jnp.einsum("pnd,pkd->pnk", x0, w0) * g0), EPS))
    w1 = _softplus(params["weight_raw_1"]) ** 2
    g1 = jax.nn.sigmoid(params["gate_raw_1"]).reshape(P, 1, 1)
    x1 = jnp.einsum("pnk,pjk->pnj", jnp.exp(z0), w1) + params["bias_1"][:, None, :]
    res = jnp.einsum("pnk,pkj->pnj", jnp.exp(z0), params["z_weight"])
    z1 = jnp.log(_softplus(x1 * g1 + res) + EPS)
    out = z1 + params["output_bias"][:, None, :]
    out = jnp.transpose(out, (1, 0, 2)).reshape(B, H, S, P, D)
    out = out * tau[..., None]
    out = jnp.swapaxes(out, -2, -1)                               # (B,H,S,D,P)
    m = jnp.max(out, axis=-1, keepdims=True)
    lse = (m + jnp.log(jnp.sum(jnp.exp(out - m), axis=-1, keepdims=True)))[..., 0]
    result_log = lse / tau
    if kind == 0:
        return result_log.mean(axis=-1)
    return result_log


if __name__ == "__main__":
    B, H, S, D, P = 2, 4, 8, 32, 3
    key = jax.random.PRNGKey(0)
    kx, kp = jax.random.split(key)
    x = jax.random.normal(kx, (B, H, S, D), jnp.float32)
    params = init_params(kp, D, P)
    folded = fold_params(params, D, P)     # hoisted: once per parameter update

    out_vec = jax.block_until_ready(log_batched_hull(x, folded, kind=1))  # vector head
    out_sca = jax.block_until_ready(log_batched_hull(x, folded, kind=0))  # scalar head

    assert out_vec.shape == (B, H, S, D)
    assert out_sca.shape == (B, H, S)

    ref_vec = reference_forward(x, params, kind=1)
    ref_sca = reference_forward(x, params, kind=0)
    # bf16 MXU/activation path + approx reciprocal -> modest tolerance
    np.testing.assert_allclose(np.asarray(out_vec), np.asarray(ref_vec), rtol=1e-2, atol=1e-2)
    np.testing.assert_allclose(np.asarray(out_sca), np.asarray(ref_sca), rtol=1e-2, atol=1e-2)

    print("KERNEL_OK")
</pallas_src>

<mosaic_0001>
module attributes {stable_mosaic.version = 11 : i64} {
  func.func @hull_kernel(%arg0: i32, %arg1: memref<64x32xf32, #tpu.memory_space<vmem>>, %arg2: memref<1x32xf32, #tpu.memory_space<vmem>>, %arg3: memref<1x1xf32, #tpu.memory_space<vmem>>, %arg4: memref<32x256xbf16, #tpu.memory_space<vmem>>, %arg5: memref<256x128xbf16, #tpu.memory_space<vmem>>, %arg6: memref<1x128xf32, #tpu.memory_space<vmem>>, %arg7: memref<1x128xf32, #tpu.memory_space<vmem>>, %arg8: memref<64x32xf32, #tpu.memory_space<vmem>>) attributes {dimension_semantics = [#tpu.dimension_semantics<parallel>], iteration_bounds = array<i64: 1>, scalar_prefetch = 0 : i64, scratch_operands = 0 : i64, tpu.core_type = #tpu.core_type<tc>, window_params = [{transform_indices = @transform_0, window_bounds = array<i64: 64, 32>}, {pipeline_mode = #tpu.pipeline_mode<synchronous>, transform_indices = @transform_1, window_bounds = array<i64: 1, 32>}, {pipeline_mode = #tpu.pipeline_mode<synchronous>, transform_indices = @transform_2, window_bounds = array<i64: 1, 1>}, {pipeline_mode = #tpu.pipeline_mode<synchronous>, transform_indices = @transform_3, window_bounds = array<i64: 32, 256>}, {pipeline_mode = #tpu.pipeline_mode<synchronous>, transform_indices = @transform_4, window_bounds = array<i64: 256, 128>}, {pipeline_mode = #tpu.pipeline_mode<synchronous>, transform_indices = @transform_5, window_bounds = array<i64: 1, 128>}, {pipeline_mode = #tpu.pipeline_mode<synchronous>, transform_indices = @transform_6, window_bounds = array<i64: 1, 128>}, {transform_indices = @transform_7, window_bounds = array<i64: 64, 32>}]} {
    %c0 = arith.constant 0 : index
    %c0_0 = arith.constant 0 : index
    %0 = vector.load %arg1[%c0, %c0_0] : memref<64x32xf32, #tpu.memory_space<vmem>>, vector<64x32xf32>
    %c0_1 = arith.constant 0 : index
    %c0_2 = arith.constant 0 : index
    %1 = vector.load %arg2[%c0_1, %c0_2] : memref<1x32xf32, #tpu.memory_space<vmem>>, vector<1x32xf32>
    %2 = vector.broadcast %1 : vector<1x32xf32> to vector<64x32xf32>
    %3 = arith.mulf %0, %2 : vector<64x32xf32>
    %cst = arith.constant dense<0.000000e+00> : vector<64xf32>
    %4 = vector.multi_reduction <add>, %3, %cst [1] : vector<64x32xf32> to vector<64xf32>
    %5 = vector.shape_cast %4 : vector<64xf32> to vector<64x1xf32>
    %c0_3 = arith.constant 0 : index
    %c0_4 = arith.constant 0 : index
    %6 = vector.load %arg3[%c0_3, %c0_4] : memref<1x1xf32, #tpu.memory_space<vmem>>, vector<1x1xf32>
    %7 = vector.broadcast %6 : vector<1x1xf32> to vector<64x1xf32>
    %8 = arith.addf %5, %7 : vector<64x1xf32>
    %cst_5 = arith.constant 2.000000e+01 : f32
    %9 = vector.broadcast %cst_5 : f32 to vector<64x1xf32>
    %10 = arith.cmpf ogt, %8, %9 : vector<64x1xf32>
    %cst_6 = arith.constant 2.000000e+01 : f32
    %11 = vector.broadcast %cst_6 : f32 to vector<64x1xf32>
    %12 = arith.minimumf %8, %11 : vector<64x1xf32>
    %13 = math.exp %12 : vector<64x1xf32>
    %cst_7 = arith.constant 1.000000e+00 : f32
    %14 = vector.broadcast %cst_7 : f32 to vector<64x1xf32>
    %15 = arith.addf %14, %13 : vector<64x1xf32>
    %16 = math.log %15 : vector<64x1xf32>
    %17 = arith.select %10, %8, %16 : vector<64x1xi1>, vector<64x1xf32>
    %cst_8 = arith.constant 0.000000e+00 : f32
    %18 = vector.broadcast %cst_8 : f32 to vector<64x1xf32>
    %19 = arith.subf %18, %17 : vector<64x1xf32>
    %cst_9 = arith.constant 2.000000e+01 : f32
    %20 = vector.broadcast %cst_9 : f32 to vector<64x1xf32>
    %21 = arith.cmpf ogt, %19, %20 : vector<64x1xf32>
    %cst_10 = arith.constant 2.000000e+01 : f32
    %22 = vector.broadcast %cst_10 : f32 to vector<64x1xf32>
    %23 = arith.minimumf %19, %22 : vector<64x1xf32>
    %24 = math.exp %23 : vector<64x1xf32>
    %cst_11 = arith.constant 1.000000e+00 : f32
    %25 = vector.broadcast %cst_11 : f32 to vector<64x1xf32>
    %26 = arith.addf %25, %24 : vector<64x1xf32>
    %27 = math.log %26 : vector<64x1xf32>
    %28 = arith.select %21, %19, %27 : vector<64x1xi1>, vector<64x1xf32>
    %cst_12 = arith.constant 0.000000e+00 : f32
    %29 = vector.broadcast %cst_12 : f32 to vector<64x1xf32>
    %30 = arith.subf %29, %28 : vector<64x1xf32>
    %31 = vector.broadcast %30 : vector<64x1xf32> to vector<64x32xf32>
    %32 = arith.addf %0, %31 : vector<64x32xf32>
    %33 = arith.mulf %32, %32 : vector<64x32xf32>
    %cst_13 = arith.constant dense<0.000000e+00> : vector<64xf32>
    %34 = vector.multi_reduction <add>, %33, %cst_13 [1] : vector<64x32xf32> to vector<64xf32>
    %35 = vector.shape_cast %34 : vector<64xf32> to vector<64x1xf32>
    %cst_14 = arith.constant 3.200000e+01 : f32
    %36 = vector.broadcast %cst_14 : f32 to vector<64x1xf32>
    %37 = arith.divf %35, %36 : vector<64x1xf32>
    %cst_15 = arith.constant 9.99999997E-7 : f32
    %38 = vector.broadcast %cst_15 : f32 to vector<64x1xf32>
    %39 = arith.addf %37, %38 : vector<64x1xf32>
    %40 = math.sqrt %39 : vector<64x1xf32>
    %cst_16 = arith.constant 3.034300e-01 : f32
    %41 = vector.broadcast %cst_16 : f32 to vector<64x1xf32>
    %42 = arith.mulf %41, %40 : vector<64x1xf32>
    %cst_17 = arith.constant 2.215900e-01 : f32
    %43 = vector.broadcast %cst_17 : f32 to vector<64x1xf32>
    %44 = arith.addf %42, %43 : vector<64x1xf32>
    %45 = math.exp %44 : vector<64x1xf32>
    %cst_18 = arith.constant 2.000000e+01 : f32
    %46 = vector.broadcast %cst_18 : f32 to vector<64x1xf32>
    %47 = arith.minimumf %45, %46 : vector<64x1xf32>
    %48 = tpu.reciprocal %47 {approx = true} : vector<64x1xf32> -> vector<64x1xf32>
    %49 = arith.truncf %32 : vector<64x32xf32> to vector<64x32xbf16>
    %c0_19 = arith.constant 0 : index
    %c0_20 = arith.constant 0 : index
    %50 = vector.load %arg4[%c0_19, %c0_20] : memref<32x256xbf16, #tpu.memory_space<vmem>>, vector<32x256xbf16>
    %cst_21 = arith.constant dense<0.000000e+00> : vector<64x256xf32>
    %51 = tpu.matmul %49, %50, %cst_21 {dimension_numbers = #tpu.dot_dimension_numbers<[1], [0], [0], [1], [0, 0, 1, 1], [], []>} : vector<64x32xbf16>, vector<32x256xbf16>, vector<64x256xf32> -> vector<64x256xf32>
    %cst_22 = arith.constant 2.000000e+01 : f32
    %52 = vector.broadcast %cst_22 : f32 to vector<64x256xf32>
    %53 = arith.cmpf ogt, %51, %52 : vector<64x256xf32>
    %cst_23 = arith.constant 2.000000e+01 : f32
    %54 = vector.broadcast %cst_23 : f32 to vector<64x256xf32>
    %55 = arith.minimumf %51, %54 : vector<64x256xf32>
    %56 = math.exp %55 : vector<64x256xf32>
    %cst_24 = arith.constant 1.000000e+00 : f32
    %57 = vector.broadcast %cst_24 : f32 to vector<64x256xf32>
    %58 = arith.addf %57, %56 : vector<64x256xf32>
    %59 = math.log %58 : vector<64x256xf32>
    %60 = arith.select %53, %51, %59 : vector<64x256xi1>, vector<64x256xf32>
    %cst_25 = arith.constant 9.99999997E-7 : f32
    %61 = vector.broadcast %cst_25 : f32 to vector<64x256xf32>
    %62 = arith.maximumf %60, %61 : vector<64x256xf32>
    %63 = arith.truncf %62 : vector<64x256xf32> to vector<64x256xbf16>
    %c0_26 = arith.constant 0 : index
    %c0_27 = arith.constant 0 : index
    %64 = vector.load %arg5[%c0_26, %c0_27] : memref<256x128xbf16, #tpu.memory_space<vmem>>, vector<256x128xbf16>
    %cst_28 = arith.constant dense<0.000000e+00> : vector<64x128xf32>
    %65 = tpu.matmul %63, %64, %cst_28 {dimension_numbers = #tpu.dot_dimension_numbers<[1], [0], [0], [1], [0, 0, 1, 1], [], []>} : vector<64x256xbf16>, vector<256x128xbf16>, vector<64x128xf32> -> vector<64x128xf32>
    %c0_29 = arith.constant 0 : index
    %c0_30 = arith.constant 0 : index
    %66 = vector.load %arg6[%c0_29, %c0_30] : memref<1x128xf32, #tpu.memory_space<vmem>>, vector<1x128xf32>
    %67 = vector.broadcast %66 : vector<1x128xf32> to vector<64x128xf32>
    %68 = arith.addf %65, %67 : vector<64x128xf32>
    %cst_31 = arith.constant 2.000000e+01 : f32
    %69 = vector.broadcast %cst_31 : f32 to vector<64x128xf32>
    %70 = arith.cmpf ogt, %68, %69 : vector<64x128xf32>
    %cst_32 = arith.constant 2.000000e+01 : f32
    %71 = vector.broadcast %cst_32 : f32 to vector<64x128xf32>
    %72 = arith.minimumf %68, %71 : vector<64x128xf32>
    %73 = math.exp %72 : vector<64x128xf32>
    %cst_33 = arith.constant 1.000000e+00 : f32
    %74 = vector.broadcast %cst_33 : f32 to vector<64x128xf32>
    %75 = arith.addf %74, %73 : vector<64x128xf32>
    %76 = math.log %75 : vector<64x128xf32>
    %77 = arith.select %70, %68, %76 : vector<64x128xi1>, vector<64x128xf32>
    %cst_34 = arith.constant 9.99999997E-7 : f32
    %78 = vector.broadcast %cst_34 : f32 to vector<64x128xf32>
    %79 = arith.addf %77, %78 : vector<64x128xf32>
    %80 = math.log %79 : vector<64x128xf32>
    %c0_35 = arith.constant 0 : index
    %c0_36 = arith.constant 0 : index
    %81 = vector.load %arg7[%c0_35, %c0_36] : memref<1x128xf32, #tpu.memory_space<vmem>>, vector<1x128xf32>
    %82 = vector.broadcast %81 : vector<1x128xf32> to vector<64x128xf32>
    %83 = arith.addf %80, %82 : vector<64x128xf32>
    %84 = vector.broadcast %47 : vector<64x1xf32> to vector<64x128xf32>
    %85 = arith.mulf %83, %84 : vector<64x128xf32>
    %86 = vector.extract_strided_slice %85 {offsets = [0, 0], sizes = [64, 32], strides = [1, 1]} : vector<64x128xf32> to vector<64x32xf32>
    %87 = vector.extract_strided_slice %85 {offsets = [0, 32], sizes = [64, 32], strides = [1, 1]} : vector<64x128xf32> to vector<64x32xf32>
    %88 = arith.maximumf %86, %87 : vector<64x32xf32>
    %89 = vector.extract_strided_slice %85 {offsets = [0, 64], sizes = [64, 32], strides = [1, 1]} : vector<64x128xf32> to vector<64x32xf32>
    %90 = arith.maximumf %88, %89 : vector<64x32xf32>
    %cst_37 = arith.constant 0.000000e+00 : f32
    %91 = vector.broadcast %cst_37 : f32 to vector<64x32xf32>
    %92 = tpu.concatenate %90, %90, %90, %91 in 1 : vector<64x32xf32>, vector<64x32xf32>, vector<64x32xf32>, vector<64x32xf32> -> vector<64x128xf32>
    %93 = arith.subf %85, %92 : vector<64x128xf32>
    %94 = math.exp %93 : vector<64x128xf32>
    %95 = vector.extract_strided_slice %94 {offsets = [0, 0], sizes = [64, 32], strides = [1, 1]} : vector<64x128xf32> to vector<64x32xf32>
    %96 = vector.extract_strided_slice %94 {offsets = [0, 32], sizes = [64, 32], strides = [1, 1]} : vector<64x128xf32> to vector<64x32xf32>
    %97 = arith.addf %95, %96 : vector<64x32xf32>
    %98 = vector.extract_strided_slice %94 {offsets = [0, 64], sizes = [64, 32], strides = [1, 1]} : vector<64x128xf32> to vector<64x32xf32>
    %99 = arith.addf %97, %98 : vector<64x32xf32>
    %100 = math.log %99 : vector<64x32xf32>
    %101 = arith.addf %90, %100 : vector<64x32xf32>
    %102 = vector.broadcast %48 : vector<64x1xf32> to vector<64x32xf32>
    %103 = arith.mulf %101, %102 : vector<64x32xf32>
    %c0_38 = arith.constant 0 : index
    %c0_39 = arith.constant 0 : index
    %104 = vector.load %arg8[%c0_38, %c0_39] : memref<64x32xf32, #tpu.memory_space<vmem>>, vector<64x32xf32>
    tpu.vector_store %arg8[%c0_38, %c0_39], %103 {strides = array<i32>} : memref<64x32xf32, #tpu.memory_space<vmem>>, vector<64x32xf32>,
    return
  }
  func.func @transform_0(%arg0: i32) -> (i32, i32) {
    %c0_i32 = arith.constant 0 : i32
    %c0_i32_0 = arith.constant 0 : i32
    return %arg0, %c0_i32 : i32, i32
  }
  func.func @transform_1(%arg0: i32) -> (i32, i32) {
    %c0_i32 = arith.constant 0 : i32
    %c0_i32_0 = arith.constant 0 : i32
    %c0_i32_1 = arith.constant 0 : i32
    return %c0_i32, %c0_i32_0 : i32, i32
  }
  func.func @transform_2(%arg0: i32) -> (i32, i32) {
    %c0_i32 = arith.constant 0 : i32
    %c0_i32_0 = arith.constant 0 : i32
    %c0_i32_1 = arith.constant 0 : i32
    return %c0_i32, %c0_i32_0 : i32, i32
  }
  func.func @transform_3(%arg0: i32) -> (i32, i32) {
    %c0_i32 = arith.constant 0 : i32
    %c0_i32_0 = arith.constant 0 : i32
    %c0_i32_1 = arith.constant 0 : i32
    return %c0_i32, %c0_i32_0 : i32, i32
  }
  func.func @transform_4(%arg0: i32) -> (i32, i32) {
    %c0_i32 = arith.constant 0 : i32
    %c0_i32_0 = arith.constant 0 : i32
    %c0_i32_1 = arith.constant 0 : i32
    return %c0_i32, %c0_i32_0 : i32, i32
  }
  func.func @transform_5(%arg0: i32) -> (i32, i32) {
    %c0_i32 = arith.constant 0 : i32
    %c0_i32_0 = arith.constant 0 : i32
    %c0_i32_1 = arith.constant 0 : i32
    return %c0_i32, %c0_i32_0 : i32, i32
  }
  func.func @transform_6(%arg0: i32) -> (i32, i32) {
    %c0_i32 = arith.constant 0 : i32
    %c0_i32_0 = arith.constant 0 : i32
    %c0_i32_1 = arith.constant 0 : i32
    return %c0_i32, %c0_i32_0 : i32, i32
  }
  func.func @transform_7(%arg0: i32) -> (i32, i32) {
    %c0_i32 = arith.constant 0 : i32
    %c0_i32_0 = arith.constant 0 : i32
    return %arg0, %c0_i32 : i32, i32
  }
}

</mosaic_0001>

<bundles_post_ra>
// kernel: tpu_custom_call.1
= control target key start
LH: loop header
LB: loop body
LE: loop exit
PB: predicated region body
PF: predicated region fallthrough
CT: control target
= control target key end

     0   :  { %s2443_s0 = inlined_call_operand.vmem [shape: f32[64,32], index: 0, kind: input, shape index: {}]   ;;  %s2444_s1 = inlined_call_operand.vmem [shape: f32[1,32], index: 1, kind: input, shape index: {}]   ;;  %s2445_s2 = inlined_call_operand.<no memory space> [shape: f32[1,1], index: 2, kind: input, shape index: {}]   ;;  %s2446_s3 = inlined_call_operand.vmem [shape: bf16[32,256], index: 3, kind: input, shape index: {}]   ;;  %s2447_s4 = inlined_call_operand.hbm [shape: bf16[256,128], index: 4, kind: input, shape index: {}]   ;;  %s2448_s5 = inlined_call_operand.vmem [shape: f32[1,128], index: 5, kind: input, shape index: {}]   ;;  %s2449_s6 = inlined_call_operand.vmem [shape: f32[1,128], index: 6, kind: input, shape index: {}]   ;;  %s2450_s7 = inlined_call_operand.vmem [shape: f32[64,32], index: 7, kind: output, shape index: {}]  }
   0x1   :  { %v12_v0 = vstv %s2445_s2 }
   0x2   :  { %13 = vst [vmem:[#allocation2] sm:$0x1] %v12_v0 }
   0x3   :  { %14 = vsyncpa [#allocation4], 0  ;;  %s1716_s26 = smov [#allocation3]   ;;  %s1692_s30 = scalar_lea.hbm %s2447_s4, 2048 }
   0x4   :  { %s28_s27 = sshll.u32 %s1716_s26, 4  ;;  %p1693_p0 = scmp.ne.s32.totalorder %s2447_s4, %s1692_s30  ;;  %s29_s27 = int_to_ptr.vmem [resolvable:$true] %s28_s27 }
   0x5   :  { %p1696_p1 = scmp.lt.u32.totalorder %s1692_s30, %s2447_s4 }
   0x7   :  { %p1698_p2 = pnand %p1696_p1, %p1693_p0 }
   0x9   :  { %1701 = shalt.err (!%p1698_p2)
}
   0xa   :  { %s1702_s2 = scalar_lea.vmem %s29_s27, 2048  ;;  %p1707_p4 = scmp.lt.s32.totalorder %s29_s27, %s29_s27 }
   0xb   :  { %p1703_p3 = scmp.ne.s32.totalorder %s29_s27, %s1702_s2  ;;  %p1708_p5 = scmp.lt.s32.totalorder %s1702_s2, %s1702_s2 }
   0xd   :  { %p1709_p6 = por %p1708_p5, %p1707_p4 }
   0xf   :  { %p1710_p7 = pnand %p1709_p6, %p1703_p3 }
  0x11   :  { %1713 = shalt.err (!%p1710_p7)
}
  0x12   :  { %s1717_s12 = smov 64   ;;  %s1718_s13 = smov 4  }
  0x13   :  { %34 = dma.hbm_to_vmem [thread:$0]  %s2447_s4, 2048, %s29_s27, [#allocation4], %s1717_s12, %s1717_s12, %s1718_s13  }
  0x14   :  { %1714 = dma.done.wait [#allocation4], 2048  }
  0x15   :  { %1715 = vsyncadd [#allocation4], 4294965248  ;;  %v1782_v1 = vld [vmem:[%s2443_s0 + $0x10] sm:$0xff]  ;;  %v1322_v2 = vld [vmem:[%s2444_s1] ss:$0 sm:$0xff]  ;;  %vm66_vm0 = vcmask 261120  }
  0x16   :  { %v1790_v3 = vld [vmem:[%s2443_s0] sm:$0xff]  ;;  %v60_v4 = vmul.f32 %v1322_v2, %v1782_v1  ;;  %v1797_v6 = vld [vmem:[%s2443_s0 + $0x18] sm:$0xff]  ;;  %v1802_v7 = vld [vmem:[%s2443_s0 + $0x8] sm:$0xff]  ;;  %v1719_v26 = vmov 0   ;;  %s1721_s18 = smov 32  }
  0x17   :  { %v58_v5 = vmul.f32 %v1322_v2, %v1790_v3  ;;  %v1807_v8 = vld [vmem:[%s2443_s0 + $0x28] sm:$0xff]  ;;  %v61_v9 = vmul.f32 %v1322_v2, %v1797_v6  ;;  %v59_v10 = vmul.f32 %v1322_v2, %v1802_v7  ;;  %v1815_v12 = vld [vmem:[%s2443_s0 + $0x20] sm:$0xff]  ;;  %v1820_v13 = vld [vmem:[%s2443_s0 + $0x38] sm:$0xff]  ;;  %1412 = vset.pattern.permute.xlu0 %v1719_v26  ;;  %1413 = vset.pattern.permute.xlu1 %v1719_v26 }
  0x18   :  { %v63_v11 = vmul.f32 %v1322_v2, %v1807_v8  ;;  %v1825_v14 = vld [vmem:[%s2443_s0 + $0x30] sm:$0xff]  ;;  %v73_v15 = vsel %vm66_vm0, %v60_v4, 0.0  ;;  %v62_v17 = vmul.f32 %v1322_v2, %v1815_v12  ;;  %v65_v18 = vmul.f32 %v1322_v2, %v1820_v13  ;;  %523 = vmatprep.mubr.bf16.mxu0 %v1719_v26  ;;  %v1323_v27 = vld [vmem:[#allocation2] ss:$0 sm:$0xff] }
  0x19   :  { %v67_v16 = vsel %vm66_vm0, %v58_v5, 0.0  ;;  %74 = vadd.xlane.f32.xlu1 %v73_v15  ;;  %v76_v19 = vsel %vm66_vm0, %v61_v9, 0.0  ;;  %v70_v20 = vsel %vm66_vm0, %v59_v10, 0.0  ;;  %v64_v21 = vmul.f32 %v1322_v2, %v1825_v14 }
  0x1a   :  { %68 = vadd.xlane.f32.xlu0 %v67_v16  ;;  %v82_v22 = vsel %vm66_vm0, %v63_v11, 0.0  ;;  %v79_v23 = vsel %vm66_vm0, %v62_v17, 0.0  ;;  %v88_v24 = vsel %vm66_vm0, %v65_v18, 0.0 }
  0x1b   :  { %v85_v25 = vsel %vm66_vm0, %v64_v21, 0.0 }
  0x1d   :  { %77 = vadd.xlane.f32.xlu1 %v76_v19 }
  0x1e   :  { %71 = vadd.xlane.f32.xlu0 %v70_v20 }
  0x21   :  { %83 = vadd.xlane.f32.xlu1 %v82_v22 }
  0x22   :  { %80 = vadd.xlane.f32.xlu0 %v79_v23 }
  0x25   :  { %89 = vadd.xlane.f32.xlu1 %v88_v24 }
  0x26   :  { %86 = vadd.xlane.f32.xlu0 %v85_v25 }
  0xa6   :  { %v75_v28 = vpop.xlane.xlu1 %74 }
  0xa7   :  { %v69_v29 = vpop.xlane.xlu0 %68  ;;  %v1841_v30 = vadd.f32 %v1323_v27, %v75_v28 }
  0xa8   :  { %v1843_v31 = vadd.f32 %v1323_v27, %v69_v29 }
  0xa9   :  { %v116_v32 = vmin.f32 %v1841_v30, 20.0  ;;  %vm108_vm1 = vcmp.gt.f32.partialorder %v1841_v30, 20.0 }
  0xaa   :  { %v114_v33 = vmin.f32 %v1843_v31, 20.0  ;;  %v78_v34 = vpop.xlane.xlu1 %77  ;;  %vm106_vm2 = vcmp.gt.f32.partialorder %v1843_v31, 20.0 }
  0xab   :  { %v72_v35 = vpop.xlane.xlu0 %71  ;;  %v126_v36 = vmul.f32 1.442695, %v116_v32  ;;  %v1847_v38 = vadd.f32 %v1323_v27, %v78_v34 }
  0xac   :  { %v122_v37 = vmul.f32 1.442695, %v114_v33  ;;  %v1849_v39 = vadd.f32 %v1323_v27, %v72_v35 }
  0xad   :  { %1436 = vpow2.f32 %v126_v36  ;;  %v117_v40 = vmin.f32 %v1847_v38, 20.0  ;;  %vm109_vm3 = vcmp.gt.f32.partialorder %v1847_v38, 20.0 }
  0xae   :  { %1438 = vpow2.f32 %v122_v37  ;;  %v115_v41 = vmin.f32 %v1849_v39, 20.0  ;;  %v84_v42 = vpop.xlane.xlu1 %83  ;;  %vm107_vm4 = vcmp.gt.f32.partialorder %v1849_v39, 20.0 }
  0xaf   :  { %v81_v43 = vpop.xlane.xlu0 %80  ;;  %v128_v44 = vmul.f32 1.442695, %v117_v40  ;;  %v1853_v45 = vadd.f32 %v1323_v27, %v84_v42 }
  0xb0   :  { %v1855_v46 = vadd.f32 %v1323_v27, %v81_v43  ;;  %v124_v47 = vmul.f32 1.442695, %v115_v41 }
  0xb1   :  { %1440 = vpow2.f32 %v128_v44  ;;  %v119_v48 = vmin.f32 %v1853_v45, 20.0  ;;  %vm111_vm5 = vcmp.gt.f32.partialorder %v1853_v45, 20.0 }
  0xb2   :  { %1442 = vpow2.f32 %v124_v47  ;;  %v118_v49 = vmin.f32 %v1855_v46, 20.0  ;;  %v90_v50 = vpop.xlane.xlu1 %89  ;;  %vm110_vm6 = vcmp.gt.f32.partialorder %v1855_v46, 20.0 }
  0xb3   :  { %v87_v51 = vpop.xlane.xlu0 %86  ;;  %v132_v52 = vmul.f32 1.442695, %v119_v48  ;;  %v1859_v53 = vadd.f32 %v1323_v27, %v90_v50 }
  0xb4   :  { %v1861_v54 = vadd.f32 %v1323_v27, %v87_v51  ;;  %v130_v55 = vmul.f32 1.442695, %v118_v49 }
  0xb5   :  { %1444 = vpow2.f32 %v132_v52  ;;  %v121_v56 = vmin.f32 %v1859_v53, 20.0  ;;  %vm113_vm7 = vcmp.gt.f32.partialorder %v1859_v53, 20.0 }
  0xb6   :  { %1446 = vpow2.f32 %v130_v55  ;;  %v120_v57 = vmin.f32 %v1861_v54, 20.0  ;;  %vm112_vm8 = vcmp.gt.f32.partialorder %v1861_v54, 20.0 }
  0xb7   :  { %v1437_v58 = vpop.eup %1436  ;;  %v136_v59 = vmul.f32 1.442695, %v121_v56 }
  0xb8   :  { %v1439_v60 = vpop.eup %1438  ;;  %v140_v61 = vadd.f32 1.0, %v1437_v58  ;;  %v134_v62 = vmul.f32 1.442695, %v120_v57 }
  0xb9   :  { %v138_v63 = vadd.f32 1.0, %v1439_v60  ;;  %1448 = vpow2.f32 %v136_v59 }
  0xba   :  { %1450 = vlog2.f32 %v140_v61 }
  0xbb   :  { %v1441_v0 = vpop.eup %1440  ;;  %1452 = vlog2.f32 %v138_v63 }
  0xbc   :  { %v1443_v2 = vpop.eup %1442  ;;  %v141_v4 = vadd.f32 1.0, %v1441_v0  ;;  %1454 = vpow2.f32 %v134_v62 }
  0xbd   :  { %v139_v5 = vadd.f32 1.0, %v1443_v2 }
  0xbe   :  { %1456 = vlog2.f32 %v141_v4 }
  0xbf   :  { %v1445_v9 = vpop.eup %1444  ;;  %1458 = vlog2.f32 %v139_v5 }
  0xc0   :  { %v1447_v10 = vpop.eup %1446  ;;  %v143_v11 = vadd.f32 1.0, %v1445_v9 }
  0xc1   :  { %v142_v15 = vadd.f32 1.0, %v1447_v10 }
  0xc2   :  { %1460 = vlog2.f32 %v143_v11 }
  0xc3   :  { %v1449_v16 = vpop.eup %1448  ;;  %1462 = vlog2.f32 %v142_v15 }
  0xc4   :  { %v1451_v17 = vpop.eup %1450  ;;  %v145_v18 = vadd.f32 1.0, %v1449_v16 }
  0xc5   :  { %v1453_v19 = vpop.eup %1452  ;;  %v151_v20 = vmul.f32 0.6931472, %v1451_v17 }
  0xc6   :  { %v1455_v21 = vpop.eup %1454  ;;  %v147_v22 = vmul.f32 0.6931472, %v1453_v19  ;;  %1464 = vlog2.f32 %v145_v18 }
  0xc7   :  { %v164_v23 = vsel %vm108_vm1, %v1841_v30, %v151_v20  ;;  %v144_v24 = vadd.f32 1.0, %v1455_v21 }
  0xc8   :  { %v1457_v25 = vpop.eup %1456  ;;  %v1868_v27 = vsub.f32 0.0, %v164_v23  ;;  %v162_v28 = vsel %vm106_vm2, %v1843_v31, %v147_v22 }
  0xc9   :  { %v1459_v29 = vpop.eup %1458  ;;  %v1871_v32 = vsub.f32 0.0, %v162_v28  ;;  %v153_v33 = vmul.f32 0.6931472, %v1457_v25  ;;  %1466 = vlog2.f32 %v144_v24 }
  0xca   :  { %v188_v34 = vmin.f32 %v1868_v27, 20.0  ;;  %v149_v35 = vmul.f32 0.6931472, %v1459_v29  ;;  %vm180_vm11 = vcmp.gt.f32.partialorder %v1868_v27, 20.0 }
  0xcb   :  { %v186_v30 = vmin.f32 %v1871_v32, 20.0  ;;  %v165_v36 = vsel %vm109_vm3, %v1847_v38, %v153_v33  ;;  %vm178_vm9 = vcmp.gt.f32.partialorder %v1871_v32, 20.0 }
  0xcc   :  { %v1461_v37 = vpop.eup %1460  ;;  %v198_v40 = vmul.f32 1.442695, %v188_v34  ;;  %v1878_v41 = vsub.f32 0.0, %v165_v36  ;;  %v163_v31 = vsel %vm107_vm4, %v1849_v39, %v149_v35 }
  0xcd   :  { %v1463_v42 = vpop.eup %1462  ;;  %v194_v43 = vmul.f32 1.442695, %v186_v30  ;;  %v1881_v44 = vsub.f32 0.0, %v163_v31  ;;  %v157_v47 = vmul.f32 0.6931472, %v1461_v37 }
  0xce   :  { %1468 = vpow2.f32 %v198_v40  ;;  %v189_v48 = vmin.f32 %v1878_v41, 20.0  ;;  %v155_v49 = vmul.f32 0.6931472, %v1463_v42  ;;  %vm181_vm12 = vcmp.gt.f32.partialorder %v1878_v41, 20.0 }
  0xcf   :  { %1470 = vpow2.f32 %v194_v43  ;;  %v187_v38 = vmin.f32 %v1881_v44, 20.0  ;;  %v167_v50 = vsel %vm111_vm5, %v1853_v45, %v157_v47  ;;  %vm179_vm10 = vcmp.gt.f32.partialorder %v1881_v44, 20.0  ;;  %v1414_v43 = vld [vmem:[%s2446_s3 + $0x4] ss:$8 sps:$4 sm:$0xff]   ;;  %v1416_v47 = vld [vmem:[%s2446_s3] ss:$8 sps:$4 sm:$0xff]  }
  0xd0   :  { %v1465_v51 = vpop.eup %1464  ;;  %v200_v39 = vmul.f32 1.442695, %v189_v48  ;;  %v1888_v52 = vsub.f32 0.0, %v167_v50  ;;  %v166_v55 = vsel %vm110_vm6, %v1855_v46, %v155_v49  ;;  %491 = vmatprep.subr.bf16.mxu0 %v1414_v43 }
  0xd1   :  { %v196_v56 = vmul.f32 1.442695, %v187_v38  ;;  %v1891_v57 = vsub.f32 0.0, %v166_v55  ;;  %v161_v58 = vmul.f32 0.6931472, %v1465_v51  ;;  %492 = vmatpush1.bf16.msra.mxu0 %v1416_v47 }
  0xd2   :  { %1472 = vpow2.f32 %v200_v39  ;;  %v191_v59 = vmin.f32 %v1888_v52, 20.0  ;;  %v1417_v39 = vld [vmem:[%s2446_s3 + $0x14] ss:$8 sps:$4 sm:$0xff]   ;;  %vm183_vm14 = vcmp.gt.f32.partialorder %v1888_v52, 20.0 }
  0xd3   :  { %v1467_v60 = vpop.eup %1466  ;;  %1474 = vpow2.f32 %v196_v56  ;;  %v190_v45 = vmin.f32 %v1891_v57, 20.0  ;;  %v169_v61 = vsel %vm113_vm7, %v1859_v53, %v161_v58  ;;  %493 = vmatprep.subr.bf16.mxu0 %v1417_v39  ;;  %vm182_vm13 = vcmp.gt.f32.partialorder %v1891_v57, 20.0  ;;  %v1428_v39 = vld [vmem:[#allocation3 + $0x60] sm:$0xff]  }
  0xd4   :  { %v159_v62 = vmul.f32 0.6931472, %v1467_v60  ;;  %v204_v63 = vmul.f32 1.442695, %v191_v59  ;;  %v1897_v2 = vsub.f32 0.0, %v169_v61 }
  0xd5   :  { %v202_v0 = vmul.f32 1.442695, %v190_v45 }
  0xd6   :  { %v168_v46 = vsel %vm112_vm8, %v1861_v54, %v159_v62  ;;  %v193_v10 = vmin.f32 %v1897_v2, 20.0  ;;  %vm185_vm1 = vcmp.gt.f32.partialorder %v1897_v2, 20.0 }
  0xd7   :  { %1476 = vpow2.f32 %v202_v0  ;;  %v1901_v4 = vsub.f32 0.0, %v168_v46 }
  0xd8   :  { %v1469_v5 = vpop.eup %1468  ;;  %1478 = vpow2.f32 %v204_v63  ;;  %v208_v19 = vmul.f32 1.442695, %v193_v10 }
  0xd9   :  { %v1471_v9 = vpop.eup %1470  ;;  %v192_v11 = vmin.f32 %v1901_v4, 20.0  ;;  %v212_v15 = vadd.f32 1.0, %v1469_v5  ;;  %vm184_vm15 = vcmp.gt.f32.partialorder %v1901_v4, 20.0 }
  0xda   :  { %v210_v53 = vadd.f32 1.0, %v1471_v9 }
  0xdb   :  { %v206_v16 = vmul.f32 1.442695, %v192_v11 }
  0xdc   :  { %v1473_v17 = vpop.eup %1472  ;;  %1480 = vlog2.f32 %v210_v53 }
  0xdd   :  { %v1475_v18 = vpop.eup %1474  ;;  %1482 = vpow2.f32 %v206_v16  ;;  %v213_v54 = vadd.f32 1.0, %v1473_v17 }
  0xde   :  { %v211_v20 = vadd.f32 1.0, %v1475_v18  ;;  %1484 = vlog2.f32 %v212_v15 }
  0xe0   :  { %1486 = vlog2.f32 %v211_v20 }
  0xe1   :  { %v1477_v21 = vpop.eup %1476  ;;  %1488 = vpow2.f32 %v208_v19 }
  0xe2   :  { %1490 = vlog2.f32 %v213_v54  ;;  %v214_v22 = vadd.f32 1.0, %v1477_v21  ;;  %v1479_v23 = vpop.eup %1478 }
  0xe3   :  { %v215_v25 = vadd.f32 1.0, %v1479_v23 }
  0xe4   :  { %1492 = vlog2.f32 %v214_v22 }
  0xe5   :  { %1494 = vlog2.f32 %v215_v25 }
  0xe6   :  { %v1481_v24 = vpop.eup %1480 }
  0xe7   :  { %v1483_v28 = vpop.eup %1482  ;;  %v219_v29 = vmul.f32 0.6931472, %v1481_v24 }
  0xe8   :  { %v1485_v33 = vpop.eup %1484  ;;  %v216_v36 = vadd.f32 1.0, %v1483_v28 }
  0xe9   :  { %v234_v34 = vsel %vm178_vm9, %v1871_v32, %v219_v29  ;;  %v223_v31 = vmul.f32 0.6931472, %v1485_v33 }
  0xea   :  { %v1487_v35 = vpop.eup %1486  ;;  %v242_v30 = vsub.f32 0.0, %v234_v34  ;;  %1496 = vlog2.f32 %v216_v36 }
  0xeb   :  { %v1489_v37 = vpop.eup %1488  ;;  %v221_v40 = vmul.f32 0.6931472, %v1487_v35  ;;  %v236_v38 = vsel %vm180_vm11, %v1868_v27, %v223_v31 }
  0xec   :  { %v1491_v42 = vpop.eup %1490  ;;  %252 = vperm.xlu0 %1412, %v242_v30   ;;  %v217_v49 = vadd.f32 1.0, %v1489_v37  ;;  %v244_v55 = vsub.f32 0.0, %v236_v38  ;;  %v1425_v38 = vld [vmem:[#allocation3 + $0x10] sm:$0xff]  }
  0xed   :  { %v235_v32 = vsel %vm179_vm10, %v1881_v44, %v221_v40  ;;  %v225_v50 = vmul.f32 0.6931472, %v1491_v42  ;;  %v1419_v44 = vld [vmem:[%s2446_s3 + $0x10] ss:$8 sps:$4 sm:$0xff]  }
  0xee   :  { %v243_v48 = vsub.f32 0.0, %v235_v32  ;;  %v1493_v51 = vpop.eup %1492  ;;  %1498 = vlog2.f32 %v217_v49  ;;  %494 = vmatpush1.bf16.msra.mxu0 %v1419_v44  ;;  %v1420_v32 = vld [vmem:[#allocation3 + $0x40] sm:$0xff]   ;;  %v1423_v49 = vld [vmem:[#allocation3 + $0x8] sm:$0xff]  }
  0xef   :  { %v237_v56 = vsel %vm181_vm12, %v1878_v41, %v225_v50  ;;  %v227_v27 = vmul.f32 0.6931472, %v1493_v51  ;;  %v1495_v58 = vpop.eup %1494  ;;  %1350 = vmatprep.subr.bf16.mxu0 %v1420_v32  ;;  %1390 = vmatprep.subr.bf16.mxu1 %v1420_v32  ;;  %v1426_v50 = vld [vmem:[#allocation3 + $0x58] sm:$0xff]   ;;  %v1429_v44 = vld [vmem:[#allocation3 + $0x20] sm:$0xff]  }
  0xf0   :  { %257 = vperm.xlu1 %1413, %v243_v48   ;;  %v245_v59 = vsub.f32 0.0, %v237_v56  ;;  %v229_v45 = vmul.f32 0.6931472, %v1495_v58  ;;  %v1421_v48 = vld [vmem:[#allocation3] sm:$0xff]   ;;  %v1427_v51 = vld [vmem:[#allocation3 + $0x18] sm:$0xff]   ;;  %v1431_v56 = vld [vmem:[#allocation3 + $0x28] sm:$0xff]  }
  0xf1   :  { %v238_v60 = vsel %vm182_vm13, %v1891_v57, %v227_v27  ;;  %1398 = vmatpush3.bf16.msra.mxu1 %v1421_v48  ;;  %v1432_v27 = vld [vmem:[#allocation3 + $0x70] sm:$0xff]  }
  0xf2   :  { %v246_v62 = vsub.f32 0.0, %v238_v60  ;;  %v239_v63 = vsel %vm183_vm14, %v1888_v52, %v229_v45  ;;  %v1433_v58 = vld [vmem:[#allocation3 + $0x30] sm:$0xff]   ;;  %v1435_v60 = vld [vmem:[#allocation3 + $0x38] sm:$0xff]  }
  0xf3   :  { %v247_v41 = vsub.f32 0.0, %v239_v63 }
  0xf4   :  { %262 = vperm.xlu1 %1413, %v244_v55   ;;  %v1497_v61 = vpop.eup %1496  ;;  %v1430_v55 = vld [vmem:[#allocation3 + $0x68] sm:$0xff]  }
  0xf5   :  { %v231_v0 = vmul.f32 0.6931472, %v1497_v61 }
  0xf7   :  { %v240_v5 = vsel %vm184_vm15, %v1901_v4, %v231_v0 }
  0xf8   :  { %267 = vperm.xlu1 %1413, %v245_v59   ;;  %v1499_v46 = vpop.eup %1498  ;;  %v248_v10 = vsub.f32 0.0, %v240_v5  ;;  %v1434_v59 = vld [vmem:[#allocation3 + $0x78] sm:$0xff]  }
  0xf9   :  { %v233_v9 = vmul.f32 0.6931472, %v1499_v46 }
  0xfb   :  { %v241_v57 = vsel %vm185_vm1, %v1897_v2, %v233_v9 }
  0xfc   :  { %272 = vperm.xlu1 %1413, %v246_v62   ;;  %v249_v11 = vsub.f32 0.0, %v241_v57 }
 0x100   :  { %277 = vperm.xlu1 %1413, %v247_v41  }
 0x104   :  { %282 = vperm.xlu1 %1413, %v248_v10  }
 0x108   :  { %287 = vperm.xlu1 %1413, %v249_v11  }
 0x16b   :  { %v253_v53 = vpop.permute.xlu0 %252 }
 0x16c   :  { %v290_v52 = vadd.f32 %v253_v53, %v1790_v3 }
 0x16e   :  { %v298_v15 = vmul.f32 %v290_v52, %v290_v52 }
 0x16f   :  { %v258_v16 = vpop.permute.xlu1 %257 }
 0x170   :  { %v291_v17 = vadd.f32 %v258_v16, %v1802_v7  ;;  %v306_v18 = vsel %vm66_vm0, %v298_v15, 0.0 }
 0x171   :  { %307 = vadd.xlane.f32.xlu1 %v306_v18 }
 0x172   :  { %v451_v4 = vpack.c.bf16 %v291_v17, %v290_v52  ;;  %v299_v19 = vmul.f32 %v291_v17, %v291_v17 }
 0x173   :  { %v263_v20 = vpop.permute.xlu1 %262 }
 0x174   :  { %v292_v54 = vadd.f32 %v263_v20, %v1782_v1  ;;  %1328 = vmatmul.mubr.msk.bf16.vlgmr.msra.gmra.mrb[0].mxu0 %vm66_vm0, %v451_v4  ;;  %v309_v2 = vsel %vm66_vm0, %v299_v19, 0.0 }
 0x175   :  { %310 = vadd.xlane.f32.xlu0 %v309_v2  ;;  %533 = vmatprep.mubr.bf16.mxu0 %v1719_v26 }
 0x176   :  { %v300_v3 = vmul.f32 %v292_v54, %v292_v54  ;;  %1351 = vmatpush3.bf16.msra.mxu0 %v1421_v48 }
 0x177   :  { %v268_v21 = vpop.permute.xlu1 %267 }
 0x178   :  { %v293_v22 = vadd.f32 %v268_v21, %v1797_v6  ;;  %v312_v7 = vsel %vm66_vm0, %v300_v3, 0.0 }
 0x179   :  { %313 = vadd.xlane.f32.xlu0 %v312_v7 }
 0x17a   :  { %v452_v23 = vpack.c.bf16 %v293_v22, %v292_v54  ;;  %v301_v24 = vmul.f32 %v293_v22, %v293_v22 }
 0x17b   :  { %v273_v25 = vpop.permute.xlu1 %272 }
 0x17c   :  { %v294_v28 = vadd.f32 %v273_v25, %v1815_v12  ;;  %1329 = vmatmul.mubr.msk.bf16.gmra.mrb[4].mxu0 %vm66_vm0, %v452_v23  ;;  %v315_v1 = vsel %vm66_vm0, %v301_v24, 0.0 }
 0x17d   :  { %316 = vadd.xlane.f32.xlu1 %v315_v1  ;;  %543 = vmatprep.mubr.bf16.mxu0 %v1719_v26 }
 0x17e   :  { %v302_v29 = vmul.f32 %v294_v28, %v294_v28 }
 0x17f   :  { %v278_v33 = vpop.permute.xlu1 %277 }
 0x180   :  { %v295_v34 = vadd.f32 %v278_v33, %v1807_v8  ;;  %v318_v6 = vsel %vm66_vm0, %v302_v29, 0.0 }
 0x181   :  { %319 = vadd.xlane.f32.xlu0 %v318_v6 }
 0x182   :  { %v453_v35 = vpack.c.bf16 %v295_v34, %v294_v28  ;;  %v303_v30 = vmul.f32 %v295_v34, %v295_v34 }
 0x183   :  { %v283_v36 = vpop.permute.xlu1 %282 }
 0x184   :  { %v296_v37 = vadd.f32 %v283_v36, %v1825_v14  ;;  %1330 = vmatmul.mubr.msk.bf16.gmra.mrb[8].mxu0 %vm66_vm0, %v453_v35  ;;  %v321_v12 = vsel %vm66_vm0, %v303_v30, 0.0 }
 0x185   :  { %322 = vadd.xlane.f32.xlu1 %v321_v12  ;;  %553 = vmatprep.mubr.bf16.mxu0 %v1719_v26  ;;  %v1422_v26 = vld [vmem:[#allocation3 + $0x48] sm:$0xff]  }
 0x186   :  { %v304_v40 = vmul.f32 %v296_v37, %v296_v37  ;;  %1352 = vmatprep.subr.bf16.mxu0 %v1422_v26  ;;  %1391 = vmatprep.subr.bf16.mxu1 %v1422_v26 }
 0x187   :  { %v288_v31 = vpop.permute.xlu1 %287  ;;  %1353 = vmatpush3.bf16.msra.mxu0 %v1423_v49  ;;  %1399 = vmatpush3.bf16.msra.mxu1 %v1423_v49 }
 0x188   :  { %v297_v42 = vadd.f32 %v288_v31, %v1820_v13  ;;  %v324_v8 = vsel %vm66_vm0, %v304_v40, 0.0  ;;  %v1424_v13 = vld [vmem:[#allocation3 + $0x50] sm:$0xff]  }
 0x189   :  { %325 = vadd.xlane.f32.xlu0 %v324_v8  ;;  %1354 = vmatprep.subr.bf16.mxu0 %v1424_v13 }
 0x18a   :  { %v454_v43 = vpack.c.bf16 %v297_v42, %v296_v37  ;;  %v305_v47 = vmul.f32 %v297_v42, %v297_v42  ;;  %1392 = vmatprep.subr.bf16.mxu1 %v1424_v13 }
 0x18b   :  { %1355 = vmatpush3.bf16.msra.mxu0 %v1425_v38  ;;  %1400 = vmatpush3.bf16.msra.mxu1 %v1425_v38 }
 0x18c   :  { %1331 = vmatmul.mubr.msk.bf16.gmra.mrb[12].mxu0 %vm66_vm0, %v454_v43  ;;  %v327_v14 = vsel %vm66_vm0, %v305_v47, 0.0  ;;  %1356 = vmatprep.subr.bf16.mxu0 %v1426_v50 }
 0x18d   :  { %328 = vadd.xlane.f32.xlu1 %v327_v14  ;;  %1393 = vmatprep.subr.bf16.mxu1 %v1426_v50 }
 0x18f   :  { %1357 = vmatpush3.bf16.msra.mxu0 %v1427_v51  ;;  %1401 = vmatpush3.bf16.msra.mxu1 %v1427_v51 }
 0x190   :  { %1358 = vmatprep.subr.bf16.mxu0 %v1428_v39  ;;  %1394 = vmatprep.subr.bf16.mxu1 %v1428_v39 }
 0x193   :  { %1359 = vmatpush3.bf16.msra.mxu0 %v1429_v44  ;;  %1402 = vmatpush3.bf16.msra.mxu1 %v1429_v44 }
 0x194   :  { %1360 = vmatprep.subr.bf16.mxu0 %v1430_v55  ;;  %1395 = vmatprep.subr.bf16.mxu1 %v1430_v55 }
 0x197   :  { %1361 = vmatpush3.bf16.msra.mxu0 %v1431_v56  ;;  %1403 = vmatpush3.bf16.msra.mxu1 %v1431_v56 }
 0x198   :  { %1362 = vmatprep.subr.bf16.mxu0 %v1432_v27  ;;  %1396 = vmatprep.subr.bf16.mxu1 %v1432_v27 }
 0x19b   :  { %1363 = vmatpush3.bf16.msra.mxu0 %v1433_v58  ;;  %1404 = vmatpush3.bf16.msra.mxu1 %v1433_v58 }
 0x19c   :  { %1364 = vmatprep.subr.bf16.mxu0 %v1434_v59  ;;  %1397 = vmatprep.subr.bf16.mxu1 %v1434_v59 }
 0x19f   :  { %1365 = vmatpush3.bf16.msra.mxu0 %v1435_v60  ;;  %1405 = vmatpush3.bf16.msra.mxu1 %v1435_v60 }
 0x247   :  { %v1956_v45 = vpop.f32.mrb[0].mxu0 }
 0x248   :  { %v580_v61 = vmin.f32 %v1956_v45, 20.0  ;;  %v1959_v62 = vpop.f32.mrb[1].mxu0  ;;  %vm564_vm2 = vcmp.gt.f32.partialorder %v1956_v45, 20.0 }
 0x249   :  { %v581_v63 = vmin.f32 %v1959_v62, 20.0  ;;  %v1962_v0 = vpop.f32.mrb[2].mxu0  ;;  %vm565_vm3 = vcmp.gt.f32.partialorder %v1959_v62, 20.0 }
 0x24a   :  { %v596_v46 = vmul.f32 1.442695, %v580_v61  ;;  %v582_v41 = vmin.f32 %v1962_v0, 20.0  ;;  %v1965_v5 = vpop.f32.mrb[3].mxu0  ;;  %vm566_vm4 = vcmp.gt.f32.partialorder %v1962_v0, 20.0 }
 0x24b   :  { %v598_v9 = vmul.f32 1.442695, %v581_v63  ;;  %v583_v10 = vmin.f32 %v1965_v5, 20.0  ;;  %vm567_vm5 = vcmp.gt.f32.partialorder %v1965_v5, 20.0 }
 0x24c   :  { %1500 = vpow2.f32 %v596_v46  ;;  %v600_v57 = vmul.f32 1.442695, %v582_v41 }
 0x24d   :  { %1502 = vpow2.f32 %v598_v9  ;;  %v602_v11 = vmul.f32 1.442695, %v583_v10 }
 0x24e   :  { %1504 = vpow2.f32 %v600_v57 }
 0x24f   :  { %1506 = vpow2.f32 %v602_v11  ;;  %v1968_v53 = vpop.f32.mrb[4].mxu0 }
 0x250   :  { %v584_v52 = vmin.f32 %v1968_v53, 20.0  ;;  %v1971_v15 = vpop.f32.mrb[5].mxu0  ;;  %vm568_vm6 = vcmp.gt.f32.partialorder %v1968_v53, 20.0 }
 0x251   :  { %v585_v16 = vmin.f32 %v1971_v15, 20.0  ;;  %v1974_v17 = vpop.f32.mrb[6].mxu0  ;;  %vm569_vm7 = vcmp.gt.f32.partialorder %v1971_v15, 20.0 }
 0x252   :  { %v604_v18 = vmul.f32 1.442695, %v584_v52  ;;  %v586_v4 = vmin.f32 %v1974_v17, 20.0  ;;  %v1977_v19 = vpop.f32.mrb[7].mxu0  ;;  %vm570_vm8 = vcmp.gt.f32.partialorder %v1974_v17, 20.0 }
 0x253   :  { %v606_v20 = vmul.f32 1.442695, %v585_v16  ;;  %v587_v54 = vmin.f32 %v1977_v19, 20.0  ;;  %vm571_vm9 = vcmp.gt.f32.partialorder %v1977_v19, 20.0 }
 0x254   :  { %1508 = vpow2.f32 %v604_v18  ;;  %v608_v2 = vmul.f32 1.442695, %v586_v4 }
 0x255   :  { %1510 = vpow2.f32 %v606_v20  ;;  %v610_v3 = vmul.f32 1.442695, %v587_v54 }
 0x256   :  { %v1501_v21 = vpop.eup %1500  ;;  %1512 = vpow2.f32 %v608_v2 }
 0x257   :  { %v1503_v22 = vpop.eup %1502  ;;  %v628_v7 = vadd.f32 1.0, %v1501_v21  ;;  %1514 = vpow2.f32 %v610_v3  ;;  %v1980_v23 = vpop.f32.mrb[8].mxu0 }
 0x258   :  { %v1505_v24 = vpop.eup %1504  ;;  %v629_v25 = vadd.f32 1.0, %v1503_v22  ;;  %v588_v28 = vmin.f32 %v1980_v23, 20.0  ;;  %v1983_v1 = vpop.f32.mrb[9].mxu0  ;;  %vm572_vm10 = vcmp.gt.f32.partialorder %v1980_v23, 20.0 }
 0x259   :  { %v1507_v29 = vpop.eup %1506  ;;  %1516 = vlog2.f32 %v628_v7  ;;  %v630_v33 = vadd.f32 1.0, %v1505_v24  ;;  %v589_v34 = vmin.f32 %v1983_v1, 20.0  ;;  %v1986_v6 = vpop.f32.mrb[10].mxu0  ;;  %vm573_vm11 = vcmp.gt.f32.partialorder %v1983_v1, 20.0 }
 0x25a   :  { %1518 = vlog2.f32 %v629_v25  ;;  %v631_v35 = vadd.f32 1.0, %v1507_v29  ;;  %v612_v30 = vmul.f32 1.442695, %v588_v28  ;;  %v1988_v36 = vpop.f32.mrb[11].mxu0  ;;  %v590_v12 = vmin.f32 %v1986_v6, 20.0 }
 0x25b   :  { %1520 = vlog2.f32 %v630_v33  ;;  %v614_v37 = vmul.f32 1.442695, %v589_v34  ;;  %v591_v40 = vmin.f32 %v1988_v36, 20.0  ;;  %vm574_vm12 = vcmp.gt.f32.partialorder %v1986_v6, 20.0 }
 0x25c   :  { %1522 = vlog2.f32 %v631_v35  ;;  %v616_v31 = vmul.f32 1.442695, %v590_v12  ;;  %vm575_vm13 = vcmp.gt.f32.partialorder %v1988_v36, 20.0 }
 0x25d   :  { %1524 = vpow2.f32 %v612_v30  ;;  %v618_v8 = vmul.f32 1.442695, %v591_v40 }
 0x25e   :  { %v1509_v42 = vpop.eup %1508  ;;  %1526 = vpow2.f32 %v614_v37 }
 0x25f   :  { %v1511_v43 = vpop.eup %1510  ;;  %v632_v47 = vadd.f32 1.0, %v1509_v42  ;;  %1528 = vpow2.f32 %v616_v31  ;;  %v1992_v14 = vpop.f32.mrb[12].mxu0 }
 0x260   :  { %v1513_v32 = vpop.eup %1512  ;;  %v633_v48 = vadd.f32 1.0, %v1511_v43  ;;  %1530 = vpow2.f32 %v618_v8  ;;  %v592_v26 = vmin.f32 %v1992_v14, 20.0  ;;  %v1995_v49 = vpop.f32.mrb[13].mxu0  ;;  %vm576_vm14 = vcmp.gt.f32.partialorder %v1992_v14, 20.0 }
 0x261   :  { %v1515_v13 = vpop.eup %1514  ;;  %1532 = vlog2.f32 %v632_v47  ;;  %v634_v38 = vadd.f32 1.0, %v1513_v32  ;;  %v593_v50 = vmin.f32 %v1995_v49, 20.0  ;;  %v1998_v51 = vpop.f32.mrb[14].mxu0  ;;  %vm577_vm15 = vcmp.gt.f32.partialorder %v1995_v49, 20.0 }
 0x262   :  { %1534 = vlog2.f32 %v633_v48  ;;  %v635_v39 = vadd.f32 1.0, %v1515_v13  ;;  %v620_v44 = vmul.f32 1.442695, %v592_v26  ;;  %v2000_v55 = vpop.f32.mrb[15].mxu0  ;;  %v594_v58 = vmin.f32 %v1998_v51, 20.0 }
 0x263   :  { %v1517_v56 = vpop.eup %1516  ;;  %1536 = vlog2.f32 %v634_v38  ;;  %v622_v27 = vmul.f32 1.442695, %v593_v50  ;;  %v595_v61 = vmin.f32 %v2000_v55, 20.0  ;;  %vm578_vm1 = vcmp.gt.f32.partialorder %v1998_v51, 20.0 }
 0x264   :  { %v1519_v59 = vpop.eup %1518  ;;  %v645_v60 = vmul.f32 0.6931472, %v1517_v56  ;;  %1538 = vlog2.f32 %v635_v39  ;;  %v624_v41 = vmul.f32 1.442695, %v594_v58 }
 0x265   :  { %v1521_v63 = vpop.eup %1520  ;;  %v647_v46 = vmul.f32 0.6931472, %v1519_v59  ;;  %1540 = vpow2.f32 %v620_v44  ;;  %v626_v11 = vmul.f32 1.442695, %v595_v61 }
 0x266   :  { %v1523_v9 = vpop.eup %1522  ;;  %v676_v10 = vsel %vm564_vm2, %v1956_v45, %v645_v60  ;;  %v649_v57 = vmul.f32 0.6931472, %v1521_v63  ;;  %1542 = vpow2.f32 %v622_v27  ;;  %vm579_vm2 = vcmp.gt.f32.partialorder %v2000_v55, 20.0 }
 0x267   :  { %v1525_v52 = vpop.eup %1524  ;;  %v677_v16 = vsel %vm565_vm3, %v1959_v62, %v647_v46  ;;  %v651_v18 = vmul.f32 0.6931472, %v1523_v9  ;;  %1544 = vpow2.f32 %v624_v41  ;;  %v692_v3 = vmax.f32 %v676_v10, 1e-06 }
 0x268   :  { %v1527_v4 = vpop.eup %1526  ;;  %v678_v20 = vsel %vm566_vm4, %v1962_v0, %v649_v57  ;;  %v636_v54 = vadd.f32 1.0, %v1525_v52  ;;  %1546 = vpow2.f32 %v626_v11  ;;  %v693_v24 = vmax.f32 %v677_v16, 1e-06 }
 0x269   :  { %v1529_v2 = vpop.eup %1528  ;;  %v694_v45 = vmax.f32 %v678_v20, 1e-06  ;;  %v679_v21 = vsel %vm567_vm5, %v1965_v5, %v651_v18  ;;  %v637_v22 = vadd.f32 1.0, %v1527_v4 }
 0x26a   :  { %v1531_v7 = vpop.eup %1530  ;;  %v695_v62 = vmax.f32 %v679_v21, 1e-06  ;;  %1548 = vlog2.f32 %v636_v54  ;;  %v638_v25 = vadd.f32 1.0, %v1529_v2 }
 0x26b   :  { %v1533_v28 = vpop.eup %1532  ;;  %v708_v29 = vpack.c.bf16 %v694_v45, %v692_v3  ;;  %1550 = vlog2.f32 %v637_v22  ;;  %v639_v33 = vadd.f32 1.0, %v1531_v7 }
 0x26c   :  { %v1535_v0 = vpop.eup %1534  ;;  %v653_v34 = vmul.f32 0.6931472, %v1533_v28  ;;  %1552 = vlog2.f32 %v638_v25  ;;  %v709_v35 = vpack.c.bf16 %v695_v62, %v693_v24 }
 0x26d   :  { %v1537_v30 = vpop.eup %1536  ;;  %1554 = vlog2.f32 %v639_v33  ;;  %v655_v37 = vmul.f32 0.6931472, %v1535_v0 }
 0x26e   :  { %v1539_v5 = vpop.eup %1538  ;;  %v680_v12 = vsel %vm568_vm6, %v1968_v53, %v653_v34  ;;  %v657_v40 = vmul.f32 0.6931472, %v1537_v30  ;;  %883 = vmatprep.mubr.bf16.mxu0 %v709_v35  ;;  %v308_v34 = vpop.xlane.xlu1 %307 }
 0x26f   :  { %v1541_v31 = vpop.eup %1540  ;;  %884 = vmatmul.mubr.bf16.vlgmr.msra.gmra.mrb[16].mxu0 %v708_v29  ;;  %v659_v42 = vmul.f32 0.6931472, %v1539_v5  ;;  %v681_v8 = vsel %vm569_vm7, %v1971_v15, %v655_v37  ;;  %v696_v26 = vmax.f32 %v680_v12, 1e-06  ;;  %v331_v35 = vmul.f32 0.03125, %v308_v34 }
 0x270   :  { %v1543_v43 = vpop.eup %1542  ;;  %v682_v47 = vsel %vm570_vm8, %v1974_v17, %v657_v40  ;;  %v640_v32 = vadd.f32 1.0, %v1541_v31  ;;  %v697_v44 = vmax.f32 %v681_v8, 1e-06  ;;  %v2044_v31 = vld [vmem:[%s2448_s5] ss:$0 sm:$0xff] }
 0x271   :  { %v1545_v48 = vpop.eup %1544  ;;  %v698_v53 = vmax.f32 %v682_v47, 1e-06  ;;  %v641_v13 = vadd.f32 1.0, %v1543_v43  ;;  %v683_v38 = vsel %vm571_vm9, %v1977_v19, %v659_v42  ;;  %v2036_v30 = vadd.f32 1e-06, %v331_v35 }
 0x272   :  { %v1547_v50 = vpop.eup %1546  ;;  %1556 = vlog2.f32 %v640_v32  ;;  %v642_v39 = vadd.f32 1.0, %v1545_v48  ;;  %v699_v56 = vmax.f32 %v683_v38, 1e-06  ;;  %v317_v40 = vpop.xlane.xlu1 %316 }
 0x273   :  { %1558 = vlog2.f32 %v641_v13  ;;  %v643_v27 = vadd.f32 1.0, %v1547_v50  ;;  %v710_v15 = vpack.c.bf16 %v698_v53, %v696_v26  ;;  %v334_v32 = vmul.f32 0.03125, %v317_v40 }
 0x274   :  { %v1549_v58 = vpop.eup %1548  ;;  %1560 = vlog2.f32 %v642_v39  ;;  %v711_v17 = vpack.c.bf16 %v699_v56, %v697_v44  ;;  %vm349_vm3 = vcmp.eq.f32.partialorder %v2036_v30, inf  ;;  %vm351_vm4 = vcmp.eq.f32.partialorder %v2036_v30, 0.0 }
 0x275   :  { %v1551_v59 = vpop.eup %1550  ;;  %v661_v60 = vmul.f32 0.6931472, %v1549_v58  ;;  %1562 = vlog2.f32 %v643_v27  ;;  %v2057_v50 = vadd.f32 1e-06, %v334_v32 }
 0x276   :  { %v1553_v61 = vpop.eup %1552  ;;  %v663_v63 = vmul.f32 0.6931472, %v1551_v59  ;;  %891 = vmatprep.mubr.bf16.mxu1 %v711_v17  ;;  %1564 = vrsqrt.f32 %v2036_v30 }
 0x277   :  { %v1555_v19 = vpop.eup %1554  ;;  %v684_v46 = vsel %vm572_vm10, %v1980_v23, %v661_v60  ;;  %v665_v41 = vmul.f32 0.6931472, %v1553_v61  ;;  %892 = vmatmul.mubr.bf16.vlgmr.msra.gmra.mrb[0].mxu1 %v710_v15  ;;  %vm370_vm9 = vcmp.eq.f32.partialorder %v2057_v50, inf  ;;  %vm372_vm10 = vcmp.eq.f32.partialorder %v2057_v50, 0.0 }
 0x278   :  { %v685_v9 = vsel %vm573_vm11, %v1983_v1, %v663_v63  ;;  %v667_v10 = vmul.f32 0.6931472, %v1555_v19  ;;  %v700_v11 = vmax.f32 %v684_v46, 1e-06  ;;  %v323_v63 = vpop.xlane.xlu1 %322 }
 0x279   :  { %v686_v57 = vsel %vm574_vm12, %v1986_v6, %v665_v41  ;;  %v701_v18 = vmax.f32 %v685_v9, 1e-06 }
 0x27a   :  { %v702_v52 = vmax.f32 %v686_v57, 1e-06  ;;  %v687_v16 = vsel %vm575_vm13, %v1988_v36, %v667_v10  ;;  %v336_v57 = vmul.f32 0.03125, %v323_v63 }
 0x27b   :  { %v703_v4 = vmax.f32 %v687_v16, 1e-06 }
 0x27c   :  { %v1557_v23 = vpop.eup %1556  ;;  %v712_v20 = vpack.c.bf16 %v702_v52, %v700_v11 }
 0x27d   :  { %v1559_v54 = vpop.eup %1558  ;;  %v669_v2 = vmul.f32 0.6931472, %v1557_v23  ;;  %v713_v3 = vpack.c.bf16 %v703_v4, %v701_v18 }
 0x27e   :  { %v1561_v45 = vpop.eup %1560  ;;  %v671_v1 = vmul.f32 0.6931472, %v1559_v54 }
 0x27f   :  { %v1563_v21 = vpop.eup %1562  ;;  %v688_v6 = vsel %vm576_vm14, %v1992_v14, %v669_v2  ;;  %v673_v22 = vmul.f32 0.6931472, %v1561_v45  ;;  %899 = vmatprep.mubr.bf16.mxu1 %v713_v3  ;;  %v352_v45 = vand.u32 2147483648, %v2036_v30 }
 0x280   :  { %v689_v36 = vsel %vm577_vm15, %v1995_v49, %v671_v1  ;;  %v675_v7 = vmul.f32 0.6931472, %v1563_v21  ;;  %900 = vmatmul.mubr.bf16.gmra.mrb[4].mxu1 %v712_v20  ;;  %v704_v62 = vmax.f32 %v688_v6, 1e-06  ;;  %v311_v49 = vpop.xlane.xlu0 %310  ;;  %v1565_v15 = vpop.eup %1564  ;;  %v2077_v1 = vadd.f32 1e-06, %v336_v57 }
 0x281   :  { %v690_v24 = vsel %vm578_vm1, %v1998_v51, %v673_v22  ;;  %v705_v29 = vmax.f32 %v689_v36, 1e-06  ;;  %v332_v37 = vmul.f32 0.03125, %v311_v49  ;;  %v348_v46 = vmul.f32 %v1565_v15, %v2036_v30  ;;  %v329_v21 = vpop.xlane.xlu1 %328 }
 0x282   :  { %v706_v25 = vmax.f32 %v690_v24, 1e-06  ;;  %v691_v28 = vsel %vm579_vm2, %v2000_v55, %v675_v7  ;;  %vm384_vm13 = vcmp.eq.f32.partialorder %v2077_v1, inf  ;;  %vm386_vm15 = vcmp.eq.f32.partialorder %v2077_v1, 0.0 }
 0x283   :  { %v707_v14 = vmax.f32 %v691_v28, 1e-06  ;;  %v2039_v51 = vadd.f32 1e-06, %v332_v37  ;;  %v350_v20 = vsel %vm349_vm3, %v2036_v30, %v348_v46 }
 0x284   :  { %v714_v33 = vpack.c.bf16 %v706_v25, %v704_v62  ;;  %v314_v5 = vpop.xlane.xlu0 %313  ;;  %v353_v24 = vsel %vm351_vm4, %v352_v45, %v350_v20 }
 0x285   :  { %v715_v0 = vpack.c.bf16 %v707_v14, %v705_v29  ;;  %v333_v12 = vmul.f32 0.03125, %v314_v5  ;;  %1566 = vrsqrt.f32 %v2039_v51  ;;  %vm356_vm5 = vcmp.eq.f32.partialorder %v2039_v51, inf }
 0x286   :  { %vm358_vm6 = vcmp.eq.f32.partialorder %v2039_v51, 0.0  ;;  %v403_v37 = vmul.f32 0.30343, %v353_v24  ;;  %v359_v5 = vand.u32 2147483648, %v2039_v51 }
 0x287   :  { %907 = vmatprep.mubr.bf16.mxu1 %v715_v0  ;;  %v2047_v47 = vadd.f32 1e-06, %v333_v12  ;;  %v338_v0 = vmul.f32 0.03125, %v329_v21 }
 0x288   :  { %908 = vmatmul.mubr.bf16.gmra.mrb[8].mxu1 %v714_v33  ;;  %v320_v39 = vpop.xlane.xlu0 %319 }
 0x289   :  { %1568 = vrsqrt.f32 %v2047_v47  ;;  %v335_v61 = vmul.f32 0.03125, %v320_v39  ;;  %vm363_vm7 = vcmp.eq.f32.partialorder %v2047_v47, inf  ;;  %vm365_vm8 = vcmp.eq.f32.partialorder %v2047_v47, 0.0 }
 0x28a   :  { %v2100_v32 = vadd.f32 1e-06, %v338_v0 }
 0x28b   :  { %v2069_v16 = vadd.f32 1e-06, %v335_v61 }
 0x28c   :  { %v326_v2 = vpop.xlane.xlu0 %325 }
 0x28d   :  { %v337_v28 = vmul.f32 0.03125, %v326_v2  ;;  %vm377_vm11 = vcmp.eq.f32.partialorder %v2069_v16, inf  ;;  %vm379_vm12 = vcmp.eq.f32.partialorder %v2069_v16, 0.0 }
 0x28f   :  { %v1567_v10 = vpop.eup %1566 }
 0x290   :  { %v355_v18 = vmul.f32 %v1567_v10, %v2039_v51 }
 0x292   :  { %v357_v14 = vsel %vm356_vm5, %v2039_v51, %v355_v18 }
 0x293   :  { %v1569_v54 = vpop.eup %1568 }
 0x294   :  { %v362_v25 = vmul.f32 %v1569_v54, %v2047_v47 }
 0x342   :  { %v1366_v55 = vpop.f32.mrb[16].mxu0 }
 0x343   :  { %v1367_v42 = vpop.f32.mrb[17].mxu0 }
 0x344   :  { %v1368_v8 = vadd.f32 %v1367_v42, %v1366_v55  ;;  %v1369_v43 = vpop.f32.mrb[18].mxu0  ;;  %v2093_v42 = vadd.f32 1e-06, %v337_v28 }
 0x345   :  { %v1370_v48 = vpop.f32.mrb[19].mxu0 }
 0x346   :  { %v2050_v26 = vadd.f32 %v1368_v8, %v2044_v31  ;;  %v1371_v53 = vadd.f32 %v1370_v48, %v1369_v43  ;;  %v360_v43 = vsel %vm358_vm6, %v359_v5, %v357_v14  ;;  %vm391_vm2 = vcmp.eq.f32.partialorder %v2093_v42, inf }
 0x347   :  { %v404_v51 = vmul.f32 0.30343, %v360_v43  ;;  %vm393_vm3 = vcmp.eq.f32.partialorder %v2093_v42, 0.0  ;;  %vm398_vm6 = vcmp.eq.f32.partialorder %v2100_v32, inf }
 0x348   :  { %v924_v13 = vmin.f32 %v2050_v26, 20.0  ;;  %v2054_v38 = vadd.f32 %v1371_v53, %v2044_v31  ;;  %vm916_vm14 = vcmp.gt.f32.partialorder %v2050_v26, 20.0 }
 0x34a   :  { %v932_v44 = vmul.f32 1.442695, %v924_v13  ;;  %v925_v56 = vmin.f32 %v2054_v38, 20.0  ;;  %v1372_v27 = vpop.f32.mrb[0].mxu1  ;;  %v364_v13 = vsel %vm363_vm7, %v2047_v47, %v362_v25  ;;  %vm917_vm1 = vcmp.gt.f32.partialorder %v2054_v38, 20.0 }
 0x34b   :  { %v1373_v58 = vpop.f32.mrb[1].mxu1  ;;  %vm400_vm7 = vcmp.eq.f32.partialorder %v2100_v32, 0.0 }
 0x34c   :  { %1570 = vpow2.f32 %v932_v44  ;;  %v934_v17 = vmul.f32 1.442695, %v925_v56  ;;  %v1374_v59 = vadd.f32 %v1373_v58, %v1372_v27  ;;  %v1375_v60 = vpop.f32.mrb[2].mxu1  ;;  %v411_v56 = vadd.f32 0.22159, %v403_v37 }
 0x34d   :  { %1572 = vrsqrt.f32 %v2057_v50  ;;  %v1376_v19 = vpop.f32.mrb[3].mxu1  ;;  %v366_v27 = vand.u32 2147483648, %v2047_v47 }
 0x34e   :  { %1574 = vpow2.f32 %v934_v17  ;;  %v2063_v41 = vadd.f32 %v1374_v59, %v2044_v31  ;;  %v1377_v9 = vadd.f32 %v1376_v19, %v1375_v60  ;;  %v373_v17 = vand.u32 2147483648, %v2057_v50 }
 0x34f   :  { %v367_v63 = vsel %vm365_vm8, %v366_v27, %v364_v13  ;;  %v419_v18 = vmul.f32 1.442695, %v411_v56 }
 0x350   :  { %v926_v11 = vmin.f32 %v2063_v41, 20.0  ;;  %v2067_v52 = vadd.f32 %v1377_v9, %v2044_v31  ;;  %v405_v2 = vmul.f32 0.30343, %v367_v63  ;;  %vm918_vm4 = vcmp.gt.f32.partialorder %v2063_v41, 20.0 }
 0x352   :  { %v936_v4 = vmul.f32 1.442695, %v926_v11  ;;  %v927_v23 = vmin.f32 %v2067_v52, 20.0  ;;  %vm919_vm5 = vcmp.gt.f32.partialorder %v2067_v52, 20.0 }
 0x353   :  { %v1378_v3 = vpop.f32.mrb[4].mxu1 }
 0x354   :  { %1576 = vpow2.f32 %v936_v4  ;;  %v938_v6 = vmul.f32 1.442695, %v927_v23  ;;  %v1379_v22 = vpop.f32.mrb[5].mxu1 }
 0x355   :  { %1578 = vrsqrt.f32 %v2069_v16  ;;  %v1380_v36 = vadd.f32 %v1379_v22, %v1378_v3  ;;  %v1381_v7 = vpop.f32.mrb[6].mxu1  ;;  %v380_v3 = vand.u32 2147483648, %v2069_v16 }
 0x356   :  { %v1571_v62 = vpop.eup %1570  ;;  %1580 = vpow2.f32 %v938_v6  ;;  %v1382_v29 = vpop.f32.mrb[7].mxu1  ;;  %v412_v6 = vadd.f32 0.22159, %v404_v51 }
 0x357   :  { %v1573_v33 = vpop.eup %1572  ;;  %v948_v34 = vadd.f32 1.0, %v1571_v62  ;;  %v2085_v49 = vadd.f32 %v1380_v36, %v2044_v31  ;;  %v1383_v35 = vadd.f32 %v1382_v29, %v1381_v7  ;;  %1582 = vrsqrt.f32 %v2077_v1 }
 0x358   :  { %v1575_v30 = vpop.eup %1574  ;;  %v369_v55 = vmul.f32 %v1573_v33, %v2057_v50  ;;  %v413_v29 = vadd.f32 0.22159, %v405_v2  ;;  %v421_v0 = vmul.f32 1.442695, %v412_v6 }
 0x359   :  { %1584 = vlog2.f32 %v948_v34  ;;  %v949_v12 = vadd.f32 1.0, %v1575_v30  ;;  %v928_v40 = vmin.f32 %v2085_v49, 20.0  ;;  %v2096_v8 = vadd.f32 %v1383_v35, %v2044_v31 }
 0x35a   :  { %v371_v19 = vsel %vm370_vm9, %v2057_v50, %v369_v55  ;;  %v387_v55 = vand.u32 2147483648, %v2077_v1  ;;  %vm920_vm8 = vcmp.gt.f32.partialorder %v2085_v49, 20.0 }
 0x35b   :  { %1586 = vlog2.f32 %v949_v12  ;;  %v940_v48 = vmul.f32 1.442695, %v928_v40  ;;  %v1384_v53 = vpop.f32.mrb[8].mxu1  ;;  %v929_v39 = vmin.f32 %v2096_v8, 20.0  ;;  %v374_v23 = vsel %vm372_vm10, %v373_v17, %v371_v19 }
 0x35c   :  { %v1385_v44 = vpop.f32.mrb[9].mxu1  ;;  %v406_v7 = vmul.f32 0.30343, %v374_v23  ;;  %vm921_vm9 = vcmp.gt.f32.partialorder %v2096_v8, 20.0 }
 0x35d   :  { %1588 = vpow2.f32 %v940_v48  ;;  %v1386_v15 = vadd.f32 %v1385_v44, %v1384_v53  ;;  %v1387_v58 = vpop.f32.mrb[10].mxu1  ;;  %v942_v60 = vmul.f32 1.442695, %v929_v39  ;;  %v423_v48 = vmul.f32 1.442695, %v413_v29 }
 0x35e   :  { %v1577_v59 = vpop.eup %1576  ;;  %1590 = vrsqrt.f32 %v2093_v42  ;;  %v1388_v61 = vpop.f32.mrb[11].mxu1  ;;  %v414_v5 = vadd.f32 0.22159, %v406_v7 }
 0x35f   :  { %v1579_v46 = vpop.eup %1578  ;;  %1592 = vrsqrt.f32 %v2100_v32  ;;  %v950_v9 = vadd.f32 1.0, %v1577_v59  ;;  %v2113_v10 = vadd.f32 %v1386_v15, %v2044_v31  ;;  %v1389_v57 = vadd.f32 %v1388_v61, %v1387_v58 }
 0x360   :  { %v1581_v11 = vpop.eup %1580  ;;  %1594 = vpow2.f32 %v942_v60  ;;  %v376_v50 = vmul.f32 %v1579_v46, %v2069_v16  ;;  %v425_v56 = vmul.f32 1.442695, %v414_v5  ;;  %v394_v60 = vand.u32 2147483648, %v2093_v42 }
 0x361   :  { %1596 = vlog2.f32 %v950_v9  ;;  %v951_v47 = vadd.f32 1.0, %v1581_v11  ;;  %v930_v4 = vmin.f32 %v2113_v10, 20.0  ;;  %v1583_v20 = vpop.eup %1582  ;;  %v2120_v54 = vadd.f32 %v1389_v57, %v2044_v31 }
 0x362   :  { %v383_v31 = vmul.f32 %v1583_v20, %v2077_v1  ;;  %v378_v34 = vsel %vm377_vm11, %v2069_v16, %v376_v50  ;;  %vm922_vm10 = vcmp.gt.f32.partialorder %v2113_v10, 20.0 }
 0x363   :  { %v1585_v45 = vpop.eup %1584  ;;  %1598 = vlog2.f32 %v951_v47  ;;  %v944_v21 = vmul.f32 1.442695, %v930_v4  ;;  %v931_v36 = vmin.f32 %v2120_v54, 20.0  ;;  %v381_v53 = vsel %vm379_vm12, %v380_v3, %v378_v34 }
 0x364   :  { %v957_v22 = vmul.f32 0.6931472, %v1585_v45  ;;  %1600 = vpow2.f32 %v419_v18  ;;  %v385_v40 = vsel %vm384_vm13, %v2077_v1, %v383_v31  ;;  %v407_v16 = vmul.f32 0.30343, %v381_v53 }
 0x365   :  { %v1587_v24 = vpop.eup %1586  ;;  %1602 = vpow2.f32 %v944_v21  ;;  %v946_v28 = vmul.f32 1.442695, %v931_v36  ;;  %v388_v27 = vsel %vm386_vm15, %v387_v55, %v385_v40  ;;  %v401_v4 = vand.u32 2147483648, %v2100_v32 }
 0x366   :  { %v972_v62 = vsel %vm916_vm14, %v2050_v26, %v957_v22  ;;  %v959_v25 = vmul.f32 0.6931472, %v1587_v24  ;;  %v408_v1 = vmul.f32 0.30343, %v388_v27  ;;  %v415_v57 = vadd.f32 0.22159, %v407_v16 }
 0x367   :  { %v1589_v14 = vpop.eup %1588  ;;  %v980_v33 = vadd.f32 1e-06, %v972_v62  ;;  %1604 = vpow2.f32 %v946_v28  ;;  %vm923_vm11 = vcmp.gt.f32.partialorder %v2120_v54, 20.0  ;;  %vm1163_vm12 = vcmask 523264  }
 0x368   :  { %v1591_v35 = vpop.eup %1590  ;;  %v973_v30 = vsel %vm917_vm1, %v2054_v38, %v959_v25  ;;  %v952_v37 = vadd.f32 1.0, %v1589_v14  ;;  %v416_v2 = vadd.f32 0.22159, %v408_v1  ;;  %vm1172_vm13 = vcmask 785408  }
 0x369   :  { %v1593_v12 = vpop.eup %1592  ;;  %1606 = vlog2.f32 %v980_v33  ;;  %v981_v26 = vadd.f32 1e-06, %v973_v30  ;;  %v390_v13 = vmul.f32 %v1591_v35, %v2093_v42 }
 0x36a   :  { %v1595_v43 = vpop.eup %1594  ;;  %1608 = vlog2.f32 %v952_v37  ;;  %v397_v58 = vmul.f32 %v1593_v12, %v2100_v32  ;;  %v429_v25 = vmul.f32 1.442695, %v416_v2 }
 0x36b   :  { %v1597_v38 = vpop.eup %1596  ;;  %1610 = vlog2.f32 %v981_v26  ;;  %v953_v39 = vadd.f32 1.0, %v1595_v43  ;;  %v392_v19 = vsel %vm391_vm2, %v2093_v42, %v390_v13  ;;  %v427_v42 = vmul.f32 1.442695, %v415_v57 }
 0x36c   :  { %v961_v44 = vmul.f32 0.6931472, %v1597_v38  ;;  %1612 = vpow2.f32 %v421_v0  ;;  %v399_v11 = vsel %vm398_vm6, %v2100_v32, %v397_v58  ;;  %v395_v47 = vsel %vm393_vm3, %v394_v60, %v392_v19 }
 0x36d   :  { %v1599_v15 = vpop.eup %1598  ;;  %1614 = vlog2.f32 %v953_v39  ;;  %v402_v50 = vsel %vm400_vm7, %v401_v4, %v399_v11  ;;  %v409_v22 = vmul.f32 0.30343, %v395_v47 }
 0x36e   :  { %v2148_v51 = vpop.eup %1600  ;;  %v974_v17 = vsel %vm918_vm4, %v2063_v41, %v961_v44  ;;  %v963_v59 = vmul.f32 0.6931472, %v1599_v15  ;;  %1616 = vpow2.f32 %v423_v48  ;;  %v410_v28 = vmul.f32 0.30343, %v402_v50 }
 0x36f   :  { %v1603_v61 = vpop.eup %1602  ;;  %v982_v63 = vadd.f32 1e-06, %v974_v17  ;;  %1618 = vpow2.f32 %v425_v56  ;;  %v435_v24 = vmin.f32 %v2148_v51, 20.0  ;;  %v417_v35 = vadd.f32 0.22159, %v409_v22 }
 0x370   :  { %v975_v46 = vsel %vm919_vm5, %v2067_v52, %v963_v59  ;;  %v954_v9 = vadd.f32 1.0, %v1603_v61  ;;  %v2165_v52 = vld [vmem:[%s2449_s6] ss:$0 sm:$0xff]  ;;  %s1720_s6 = smov 96   ;;  %v418_v26 = vadd.f32 0.22159, %v410_v28 }
 0x371   :  { %1620 = vlog2.f32 %v982_v63  ;;  %v983_v41 = vadd.f32 1e-06, %v975_v46  ;;  %v1605_v18 = vpop.eup %1604  ;;  %v431_v53 = vmul.f32 1.442695, %v417_v35 }
 0x372   :  { %1622 = vlog2.f32 %v954_v9  ;;  %v955_v20 = vadd.f32 1.0, %v1605_v18  ;;  %v433_v15 = vmul.f32 1.442695, %v418_v26 }
 0x373   :  { %v1607_v23 = vpop.eup %1606  ;;  %1624 = vlog2.f32 %v983_v41 }
 0x374   :  { %v1609_v3 = vpop.eup %1608  ;;  %v989_v45 = vmul.f32 0.6931472, %v1607_v23  ;;  %1626 = vlog2.f32 %v955_v20 }
 0x375   :  { %v1611_v21 = vpop.eup %1610  ;;  %v965_v6 = vmul.f32 0.6931472, %v1609_v3  ;;  %1628 = vpow2.f32 %v427_v42 }
 0x376   :  { %v2168_v36 = vpop.eup %1612  ;;  %v991_v7 = vmul.f32 0.6931472, %v1611_v21  ;;  %v1011_v31 = vadd.f32 %v2165_v52, %v989_v45 }
 0x377   :  { %v1615_v62 = vpop.eup %1614  ;;  %v976_v32 = vsel %vm920_vm8, %v2085_v49, %v965_v6  ;;  %v436_v37 = vmin.f32 %v2168_v36, 20.0 }
 0x378   :  { %v2174_v29 = vpop.eup %1616  ;;  %v984_v14 = vadd.f32 1e-06, %v976_v32  ;;  %v967_v33 = vmul.f32 0.6931472, %v1615_v62  ;;  %v2178_v0 = vmul.f32 %v1011_v31, %v435_v24  ;;  %v1012_v34 = vadd.f32 %v2165_v52, %v991_v7 }
 0x379   :  { %v2182_v30 = vpop.eup %1618  ;;  %v437_v13 = vmin.f32 %v2174_v29, 20.0 }
 0x37a   :  { %1630 = vlog2.f32 %v984_v14  ;;  %v977_v49 = vsel %vm921_vm9, %v2096_v8, %v967_v33  ;;  %1067 = vrot.lane.b32.xlu1 %v2178_v0, %s1717_s12  ;;  %1035 = vrot.lane.b32.xlu0 %v2178_v0, %s1720_s6  ;;  %v2192_v43 = vmul.f32 %v1012_v34, %v436_v37  ;;  %v438_v27 = vmin.f32 %v2182_v30, 20.0 }
 0x37b   :  { %v1621_v5 = vpop.eup %1620  ;;  %v985_v12 = vadd.f32 1e-06, %v977_v49  ;;  %1632 = vpow2.f32 %v429_v25 }
 0x37c   :  { %v1623_v40 = vpop.eup %1622  ;;  %v993_v55 = vmul.f32 0.6931472, %v1621_v5 }
 0x37d   :  { %v1625_v8 = vpop.eup %1624  ;;  %1634 = vlog2.f32 %v985_v12  ;;  %v969_v48 = vmul.f32 0.6931472, %v1623_v40 }
 0x37e   :  { %v995_v38 = vmul.f32 0.6931472, %v1625_v8  ;;  %1069 = vrot.lane.b32.xlu0 %v2192_v43, %s1717_s12  ;;  %1037 = vrot.lane.b32.xlu1 %v2192_v43, %s1720_s6  ;;  %v1013_v39 = vadd.f32 %v2165_v52, %v993_v55  ;;  %v1627_v44 = vpop.eup %1626  ;;  %1636 = vpow2.f32 %v431_v53 }
 0x37f   :  { %v978_v56 = vsel %vm922_vm10, %v2113_v10, %v969_v48  ;;  %v971_v16 = vmul.f32 0.6931472, %v1627_v44  ;;  %v2216_v61 = vpop.eup %1628 }
 0x380   :  { %v986_v58 = vadd.f32 1e-06, %v978_v56  ;;  %v2205_v17 = vmul.f32 %v1013_v39, %v437_v13  ;;  %v1014_v59 = vadd.f32 %v2165_v52, %v995_v38  ;;  %v439_v9 = vmin.f32 %v2216_v61, 20.0 }
 0x381   :  { %v979_v60 = vsel %vm923_vm11, %v2120_v54, %v971_v16 }
 0x382   :  { %1638 = vlog2.f32 %v986_v58  ;;  %1039 = vrot.lane.b32.xlu1 %v2205_v17, %s1720_s6  ;;  %v2214_v10 = vmul.f32 %v1014_v59, %v438_v27  ;;  %v987_v63 = vadd.f32 1e-06, %v979_v60 }
 0x383   :  { %1640 = vpow2.f32 %v433_v15 }
 0x384   :  { %v1631_v1 = vpop.eup %1630  ;;  %1041 = vrot.lane.b32.xlu0 %v2214_v10, %s1720_s6  ;;  %1642 = vlog2.f32 %v987_v63 }
 0x385   :  { %v997_v19 = vmul.f32 0.6931472, %v1631_v1  ;;  %v2220_v46 = vpop.eup %1632 }
 0x386   :  { %1071 = vrot.lane.b32.xlu1 %v2205_v17, %s1717_s12  ;;  %v440_v18 = vmin.f32 %v2220_v46, 20.0 }
 0x387   :  { %v1635_v54 = vpop.eup %1634  ;;  %v1015_v41 = vadd.f32 %v2165_v52, %v997_v19 }
 0x388   :  { %v999_v57 = vmul.f32 0.6931472, %v1635_v54  ;;  %1073 = vrot.lane.b32.xlu0 %v2214_v10, %s1717_s12  ;;  %v2234_v4 = vpop.eup %1636 }
 0x389   :  { %v2230_v11 = vmul.f32 %v1015_v41, %v439_v9  ;;  %v441_v50 = vmin.f32 %v2234_v4, 20.0 }
 0x38a   :  { %v1016_v47 = vadd.f32 %v2165_v52, %v999_v57 }
 0x38b   :  { %1043 = vrot.lane.b32.xlu1 %v2230_v11, %s1720_s6 }
 0x38c   :  { %v1639_v23 = vpop.eup %1638  ;;  %v2240_v20 = vmul.f32 %v1016_v47, %v440_v18 }
 0x38d   :  { %v1001_v2 = vmul.f32 0.6931472, %v1639_v23  ;;  %v2242_v3 = vpop.eup %1640 }
 0x38e   :  { %1045 = vrot.lane.b32.xlu0 %v2240_v20, %s1720_s6  ;;  %v1643_v45 = vpop.eup %1642  ;;  %v442_v22 = vmin.f32 %v2242_v3, 20.0 }
 0x38f   :  { %1075 = vrot.lane.b32.xlu1 %v2230_v11, %s1717_s12  ;;  %v1017_v21 = vadd.f32 %v2165_v52, %v1001_v2  ;;  %v1003_v6 = vmul.f32 0.6931472, %v1643_v45 }
 0x391   :  { %v2252_v42 = vmul.f32 %v1017_v21, %v441_v50  ;;  %v1018_v7 = vadd.f32 %v2165_v52, %v1003_v6 }
 0x392   :  { %1077 = vrot.lane.b32.xlu0 %v2240_v20, %s1717_s12 }
 0x393   :  { %1047 = vrot.lane.b32.xlu1 %v2252_v42, %s1720_s6  ;;  %v2262_v31 = vmul.f32 %v1018_v7, %v442_v22 }
 0x396   :  { %1049 = vrot.lane.b32.xlu0 %v2262_v31, %s1720_s6 }
 0x397   :  { %1079 = vrot.lane.b32.xlu1 %v2252_v42, %s1717_s12 }
 0x39a   :  { %1081 = vrot.lane.b32.xlu0 %v2262_v31, %s1717_s12 }
 0x3ec   :  { %v1068_v62 = vpop.permute.xlu1 %1067  ;;  %v1036_v32 = vpop.permute.xlu0 %1035 }
 0x3ed   :  { %v1059_v52 = vmax.f32 %v2178_v0, %v1036_v32 }
 0x3ef   :  { %v2271_v25 = vmax.f32 %v1059_v52, %v1068_v62 }
 0x3f0   :  { %v1038_v28 = vpop.permute.xlu1 %1037  ;;  %v1070_v33 = vpop.permute.xlu0 %1069 }
 0x3f1   :  { %v1060_v14 = vmax.f32 %v2192_v43, %v1038_v28  ;;  %1107 = vrot.lane.b32.xlu1 %v2271_v25, %s1721_s18 }
 0x3f3   :  { %v2276_v34 = vmax.f32 %v1060_v14, %v1070_v33 }
 0x3f4   :  { %v1040_v35 = vpop.permute.xlu1 %1039 }
 0x3f5   :  { %1131 = vrot.lane.b32.xlu1 %v2271_v25, %s1717_s12  ;;  %1109 = vrot.lane.b32.xlu0 %v2276_v34, %s1721_s18  ;;  %v1061_v5 = vmax.f32 %v2205_v17, %v1040_v35 }
 0x3f6   :  { %v1042_v49 = vpop.permute.xlu0 %1041 }
 0x3f7   :  { %v1062_v26 = vmax.f32 %v2214_v10, %v1042_v49 }
 0x3f8   :  { %v1072_v12 = vpop.permute.xlu1 %1071 }
 0x3f9   :  { %v2284_v40 = vmax.f32 %v1061_v5, %v1072_v12  ;;  %1133 = vrot.lane.b32.xlu0 %v2276_v34, %s1717_s12 }
 0x3fa   :  { %v1074_v55 = vpop.permute.xlu0 %1073 }
 0x3fb   :  { %v2288_v8 = vmax.f32 %v1062_v26, %v1074_v55  ;;  %1111 = vrot.lane.b32.xlu1 %v2284_v40, %s1721_s18 }
 0x3fd   :  { %v1044_v48 = vpop.permute.xlu1 %1043  ;;  %1113 = vrot.lane.b32.xlu0 %v2288_v8, %s1721_s18 }
 0x3fe   :  { %v1063_v53 = vmax.f32 %v2230_v11, %v1044_v48 }
 0x3ff   :  { %1135 = vrot.lane.b32.xlu1 %v2284_v40, %s1717_s12 }
 0x400   :  { %v1046_v38 = vpop.permute.xlu0 %1045 }
 0x401   :  { %v1076_v39 = vpop.permute.xlu1 %1075  ;;  %1137 = vrot.lane.b32.xlu0 %v2288_v8, %s1717_s12  ;;  %v1064_v56 = vmax.f32 %v2240_v20, %v1046_v38 }
 0x402   :  { %v2299_v44 = vmax.f32 %v1063_v53, %v1076_v39 }
 0x404   :  { %v1078_v15 = vpop.permute.xlu0 %1077  ;;  %1115 = vrot.lane.b32.xlu1 %v2299_v44, %s1721_s18 }
 0x405   :  { %v2304_v58 = vmax.f32 %v1064_v56, %v1078_v15  ;;  %v1048_v16 = vpop.permute.xlu1 %1047 }
 0x406   :  { %v1065_v59 = vmax.f32 %v2252_v42, %v1048_v16 }
 0x407   :  { %1117 = vrot.lane.b32.xlu0 %v2304_v58, %s1721_s18 }
 0x408   :  { %v1050_v60 = vpop.permute.xlu0 %1049  ;;  %1139 = vrot.lane.b32.xlu1 %v2299_v44, %s1717_s12 }
 0x409   :  { %v1080_v63 = vpop.permute.xlu1 %1079  ;;  %v1066_v19 = vmax.f32 %v2262_v31, %v1050_v60 }
 0x40a   :  { %v2311_v1 = vmax.f32 %v1065_v59, %v1080_v63 }
 0x40b   :  { %1141 = vrot.lane.b32.xlu0 %v2304_v58, %s1717_s12 }
 0x40c   :  { %v1082_v54 = vpop.permute.xlu0 %1081  ;;  %1119 = vrot.lane.b32.xlu1 %v2311_v1, %s1721_s18 }
 0x40d   :  { %v2318_v41 = vmax.f32 %v1066_v19, %v1082_v54 }
 0x40f   :  { %1121 = vrot.lane.b32.xlu0 %v2318_v41, %s1721_s18 }
 0x410   :  { %1143 = vrot.lane.b32.xlu1 %v2311_v1, %s1717_s12 }
 0x413   :  { %1145 = vrot.lane.b32.xlu0 %v2318_v41, %s1717_s12 }
 0x463   :  { %v1108_v57 = vpop.permute.xlu1 %1107 }
 0x464   :  { %v1155_v47 = vsel %vm66_vm0, %v2271_v25, %v1108_v57 }
 0x467   :  { %v1132_v23 = vpop.permute.xlu1 %1131  ;;  %v1110_v2 = vpop.permute.xlu0 %1109 }
 0x468   :  { %v1164_v45 = vsel %vm1163_vm12, %v1155_v47, %v1132_v23  ;;  %v1156_v7 = vsel %vm66_vm0, %v2276_v34, %v1110_v2 }
 0x469   :  { %v1173_v21 = vsel %vm1172_vm13, %v1164_v45, 0.0 }
 0x46a   :  { %v1181_v6 = vsub.f32 %v2178_v0, %v1173_v21 }
 0x46b   :  { %v1134_v62 = vpop.permute.xlu0 %1133 }
 0x46c   :  { %v1189_v32 = vmul.f32 1.442695, %v1181_v6  ;;  %v1165_v52 = vsel %vm1163_vm12, %v1156_v7, %v1134_v62 }
 0x46d   :  { %v1174_v28 = vsel %vm1172_vm13, %v1165_v52, 0.0  ;;  %v1112_v14 = vpop.permute.xlu1 %1111 }
 0x46e   :  { %1644 = vpow2.f32 %v1189_v32  ;;  %v1182_v33 = vsub.f32 %v2192_v43, %v1174_v28  ;;  %v1157_v5 = vsel %vm66_vm0, %v2284_v40, %v1112_v14 }
 0x46f   :  { %v1114_v35 = vpop.permute.xlu0 %1113 }
 0x470   :  { %v1191_v49 = vmul.f32 1.442695, %v1182_v33  ;;  %v1158_v26 = vsel %vm66_vm0, %v2288_v8, %v1114_v35 }
 0x471   :  { %v1136_v12 = vpop.permute.xlu1 %1135 }
 0x472   :  { %1646 = vpow2.f32 %v1191_v49  ;;  %v1166_v0 = vsel %vm1163_vm12, %v1157_v5, %v1136_v12 }
 0x473   :  { %v1175_v55 = vsel %vm1172_vm13, %v1166_v0, 0.0  ;;  %v1138_v48 = vpop.permute.xlu0 %1137 }
 0x474   :  { %v1183_v53 = vsub.f32 %v2205_v17, %v1175_v55  ;;  %v1167_v38 = vsel %vm1163_vm12, %v1158_v26, %v1138_v48 }
 0x475   :  { %v1176_v43 = vsel %vm1172_vm13, %v1167_v38, 0.0 }
 0x476   :  { %v1193_v39 = vmul.f32 1.442695, %v1183_v53  ;;  %v1184_v56 = vsub.f32 %v2214_v10, %v1176_v43  ;;  %v1116_v15 = vpop.permute.xlu1 %1115 }
 0x477   :  { %v1159_v63 = vsel %vm66_vm0, %v2299_v44, %v1116_v15 }
 0x478   :  { %v1645_v16 = vpop.eup %1644  ;;  %1648 = vpow2.f32 %v1193_v39  ;;  %v1195_v59 = vmul.f32 1.442695, %v1184_v56 }
 0x479   :  { %v1118_v60 = vpop.permute.xlu0 %1117  ;;  %1213 = vrot.lane.b32.xlu1 %v1645_v16, %s1720_s6 }
 0x47a   :  { %1650 = vpow2.f32 %v1195_v59  ;;  %v1140_v19 = vpop.permute.xlu1 %1139  ;;  %v1160_v10 = vsel %vm66_vm0, %v2304_v58, %v1118_v60 }
 0x47b   :  { %v1168_v17 = vsel %vm1163_vm12, %v1159_v63, %v1140_v19 }
 0x47c   :  { %v1647_v54 = vpop.eup %1646  ;;  %v1177_v57 = vsel %vm1172_vm13, %v1168_v17, 0.0 }
 0x47d   :  { %v1185_v47 = vsub.f32 %v2230_v11, %v1177_v57  ;;  %v1142_v23 = vpop.permute.xlu0 %1141  ;;  %1245 = vrot.lane.b32.xlu1 %v1645_v16, %s1717_s12  ;;  %1215 = vrot.lane.b32.xlu0 %v1647_v54, %s1720_s6 }
 0x47e   :  { %v1169_v2 = vsel %vm1163_vm12, %v1160_v10, %v1142_v23  ;;  %v1120_v45 = vpop.permute.xlu1 %1119 }
 0x47f   :  { %v1197_v21 = vmul.f32 1.442695, %v1185_v47  ;;  %v1178_v6 = vsel %vm1172_vm13, %v1169_v2, 0.0  ;;  %v1161_v11 = vsel %vm66_vm0, %v2311_v1, %v1120_v45 }
 0x480   :  { %v1186_v7 = vsub.f32 %v2240_v20, %v1178_v6 }
 0x481   :  { %1652 = vpow2.f32 %v1197_v21  ;;  %v1122_v62 = vpop.permute.xlu0 %1121  ;;  %1247 = vrot.lane.b32.xlu0 %v1647_v54, %s1717_s12 }
 0x482   :  { %v1649_v32 = vpop.eup %1648  ;;  %v1199_v52 = vmul.f32 1.442695, %v1186_v7  ;;  %v1144_v28 = vpop.permute.xlu1 %1143  ;;  %v1162_v20 = vsel %vm66_vm0, %v2318_v41, %v1122_v62 }
 0x483   :  { %v1170_v14 = vsel %vm1163_vm12, %v1161_v11, %v1144_v28  ;;  %1217 = vrot.lane.b32.xlu1 %v1649_v32, %s1720_s6 }
 0x484   :  { %v1651_v33 = vpop.eup %1650  ;;  %1654 = vpow2.f32 %v1199_v52  ;;  %v1179_v35 = vsel %vm1172_vm13, %v1170_v14, 0.0 }
 0x485   :  { %v1187_v49 = vsub.f32 %v2252_v42, %v1179_v35  ;;  %v1146_v5 = vpop.permute.xlu0 %1145  ;;  %1219 = vrot.lane.b32.xlu0 %v1651_v33, %s1720_s6 }
 0x486   :  { %v1171_v12 = vsel %vm1163_vm12, %v1162_v20, %v1146_v5 }
 0x487   :  { %v1201_v0 = vmul.f32 1.442695, %v1187_v49  ;;  %v1180_v26 = vsel %vm1172_vm13, %v1171_v12, 0.0  ;;  %1249 = vrot.lane.b32.xlu1 %v1649_v32, %s1717_s12 }
 0x488   :  { %v1188_v55 = vsub.f32 %v2262_v31, %v1180_v26 }
 0x489   :  { %1656 = vpow2.f32 %v1201_v0  ;;  %1251 = vrot.lane.b32.xlu0 %v1651_v33, %s1717_s12 }
 0x48a   :  { %v1203_v48 = vmul.f32 1.442695, %v1188_v55 }
 0x48b   :  { %v1653_v53 = vpop.eup %1652 }
 0x48c   :  { %1658 = vpow2.f32 %v1203_v48  ;;  %1221 = vrot.lane.b32.xlu1 %v1653_v53, %s1720_s6 }
 0x48e   :  { %v1655_v42 = vpop.eup %1654 }
 0x48f   :  { %1223 = vrot.lane.b32.xlu0 %v1655_v42, %s1720_s6 }
 0x490   :  { %1253 = vrot.lane.b32.xlu1 %v1653_v53, %s1717_s12 }
 0x493   :  { %v1657_v38 = vpop.eup %1656  ;;  %1255 = vrot.lane.b32.xlu0 %v1655_v42, %s1717_s12 }
 0x494   :  { %1225 = vrot.lane.b32.xlu1 %v1657_v38, %s1720_s6 }
 0x496   :  { %v2379_v43 = vpop.eup %1658 }
 0x497   :  { %1227 = vrot.lane.b32.xlu0 %v2379_v43, %s1720_s6 }
 0x498   :  { %1257 = vrot.lane.b32.xlu1 %v1657_v38, %s1717_s12 }
 0x49b   :  { %1259 = vrot.lane.b32.xlu0 %v2379_v43, %s1717_s12 }
 0x4eb   :  { %v1214_v31 = vpop.permute.xlu1 %1213 }
 0x4ec   :  { %v1237_v39 = vadd.f32 %v1645_v16, %v1214_v31 }
 0x4ef   :  { %v1246_v56 = vpop.permute.xlu1 %1245  ;;  %v1216_v15 = vpop.permute.xlu0 %1215 }
 0x4f0   :  { %v1269_v59 = vadd.f32 %v1246_v56, %v1237_v39  ;;  %v1238_v60 = vadd.f32 %v1647_v54, %v1216_v15 }
 0x4f2   :  { %1660 = vlog2.f32 %v1269_v59 }
 0x4f3   :  { %v1248_v63 = vpop.permute.xlu0 %1247  ;;  %1662 = vrcp.f32 %v435_v24 }
 0x4f4   :  { %v1270_v19 = vadd.f32 %v1248_v63, %v1238_v60 }
 0x4f5   :  { %v1218_v17 = vpop.permute.xlu1 %1217 }
 0x4f6   :  { %1664 = vlog2.f32 %v1270_v19  ;;  %v1239_v10 = vadd.f32 %v1649_v32, %v1218_v17 }
 0x4f7   :  { %v1220_v57 = vpop.permute.xlu0 %1219  ;;  %1666 = vrcp.f32 %v436_v37 }
 0x4f8   :  { %v1240_v23 = vadd.f32 %v1651_v33, %v1220_v57 }
 0x4f9   :  { %v1250_v47 = vpop.permute.xlu1 %1249 }
 0x4fa   :  { %v1271_v16 = vadd.f32 %v1250_v47, %v1239_v10 }
 0x4fb   :  { %v1252_v2 = vpop.permute.xlu0 %1251 }
 0x4fc   :  { %v1661_v45 = vpop.eup %1660  ;;  %1668 = vlog2.f32 %v1271_v16  ;;  %v1272_v21 = vadd.f32 %v1252_v2, %v1240_v23 }
 0x4fd   :  { %v1278_v54 = vmul.f32 0.6931472, %v1661_v45  ;;  %v1663_v7 = vpop.eup %1662 }
 0x4fe   :  { %1670 = vlog2.f32 %v1272_v21  ;;  %v1222_v6 = vpop.permute.xlu1 %1221 }
 0x4ff   :  { %v1293_v51 = vadd.f32 %v1278_v54, %v2271_v25  ;;  %1672 = vrcp.f32 %v437_v13  ;;  %v1241_v36 = vadd.f32 %v1653_v53, %v1222_v6 }
 0x500   :  { %v1665_v24 = vpop.eup %1664  ;;  %1674 = vrcp.f32 %v438_v27 }
 0x501   :  { %v1301_v62 = vmul.f32 %v1663_v7, %v1293_v51  ;;  %v1280_v32 = vmul.f32 0.6931472, %v1665_v24  ;;  %v1224_v37 = vpop.permute.xlu0 %1223  ;;  %v1667_v28 = vpop.eup %1666 }
 0x502   :  { %v1254_v52 = vpop.permute.xlu1 %1253  ;;  %v1242_v14 = vadd.f32 %v1655_v42, %v1224_v37 }
 0x503   :  { %1309 = vst.msk [vmem:[%s2450_s7] sm:$0xff] %vm66_vm0, %v1301_v62  ;;  %v1294_v11 = vadd.f32 %v1280_v32, %v2276_v34  ;;  %v1273_v25 = vadd.f32 %v1254_v52, %v1241_v36 }
 0x505   :  { %v1302_v29 = vmul.f32 %v1667_v28, %v1294_v11  ;;  %1676 = vlog2.f32 %v1273_v25  ;;  %v1256_v13 = vpop.permute.xlu0 %1255 }
 0x506   :  { %v1669_v33 = vpop.eup %1668  ;;  %v1274_v35 = vadd.f32 %v1256_v13, %v1242_v14  ;;  %v1226_v20 = vpop.permute.xlu1 %1225 }
 0x507   :  { %1310 = vst.msk [vmem:[%s2450_s7 + $0x8] sm:$0xff] %vm66_vm0, %v1302_v29  ;;  %v1282_v30 = vmul.f32 0.6931472, %v1669_v33  ;;  %v1243_v5 = vadd.f32 %v1657_v38, %v1226_v20 }
 0x508   :  { %v1671_v27 = vpop.eup %1670  ;;  %1678 = vlog2.f32 %v1274_v35 }
 0x509   :  { %1680 = vrcp.f32 %v439_v9  ;;  %v1295_v34 = vadd.f32 %v1282_v30, %v2284_v40  ;;  %v1284_v49 = vmul.f32 0.6931472, %v1671_v27  ;;  %v1228_v12 = vpop.permute.xlu0 %1227  ;;  %v1673_v0 = vpop.eup %1672 }
 0x50a   :  { %v1258_v26 = vpop.permute.xlu1 %1257  ;;  %v1675_v42 = vpop.eup %1674  ;;  %1682 = vrcp.f32 %v440_v18  ;;  %v1244_v31 = vadd.f32 %v2379_v43, %v1228_v12 }
 0x50b   :  { %v1303_v55 = vmul.f32 %v1673_v0, %v1295_v34  ;;  %v1296_v48 = vadd.f32 %v1284_v49, %v2288_v8  ;;  %v1275_v53 = vadd.f32 %v1258_v26, %v1243_v5 }
 0x50d   :  { %1311 = vst.msk [vmem:[%s2450_s7 + $0x10] sm:$0xff] %vm66_vm0, %v1303_v55  ;;  %v1304_v61 = vmul.f32 %v1675_v42, %v1296_v48  ;;  %1684 = vlog2.f32 %v1275_v53  ;;  %v1260_v9 = vpop.permute.xlu0 %1259 }
 0x50e   :  { %v1276_v40 = vadd.f32 %v1260_v9, %v1244_v31 }
 0x50f   :  { %v1677_v38 = vpop.eup %1676  ;;  %1312 = vst.msk [vmem:[%s2450_s7 + $0x18] sm:$0xff] %vm66_vm0, %v1304_v61 }
 0x510   :  { %v1286_v8 = vmul.f32 0.6931472, %v1677_v38  ;;  %1686 = vlog2.f32 %v1276_v40 }
 0x511   :  { %1688 = vrcp.f32 %v441_v50 }
 0x512   :  { %v1679_v46 = vpop.eup %1678  ;;  %v1297_v18 = vadd.f32 %v1286_v8, %v2299_v44  ;;  %1690 = vrcp.f32 %v442_v22 }
 0x513   :  { %v1681_v43 = vpop.eup %1680  ;;  %v1288_v39 = vmul.f32 0.6931472, %v1679_v46 }
 0x514   :  { %v1305_v56 = vmul.f32 %v1681_v43, %v1297_v18  ;;  %v1683_v59 = vpop.eup %1682 }
 0x515   :  { %v1298_v15 = vadd.f32 %v1288_v39, %v2304_v58 }
 0x516   :  { %1313 = vst.msk [vmem:[%s2450_s7 + $0x20] sm:$0xff] %vm66_vm0, %v1305_v56 }
 0x517   :  { %v1685_v60 = vpop.eup %1684  ;;  %v1306_v4 = vmul.f32 %v1683_v59, %v1298_v15 }
 0x518   :  { %v1290_v50 = vmul.f32 0.6931472, %v1685_v60 }
 0x519   :  { %1314 = vst.msk [vmem:[%s2450_s7 + $0x28] sm:$0xff] %vm66_vm0, %v1306_v4 }
 0x51a   :  { %v1687_v44 = vpop.eup %1686  ;;  %v1299_v3 = vadd.f32 %v1290_v50, %v2311_v1 }
 0x51b   :  { %v1689_v22 = vpop.eup %1688  ;;  %v1292_v63 = vmul.f32 0.6931472, %v1687_v44 }
 0x51c   :  { %v1307_v58 = vmul.f32 %v1689_v22, %v1299_v3  ;;  %v1691_v17 = vpop.eup %1690 }
 0x51d   :  { %v1300_v19 = vadd.f32 %v1292_v63, %v2318_v41 }
 0x51e   :  { %1315 = vst.msk [vmem:[%s2450_s7 + $0x30] sm:$0xff] %vm66_vm0, %v1307_v58 }
 0x51f   :  { %v1308_v57 = vmul.f32 %v1691_v17, %v1300_v19 }
 0x521   :  { %1316 = vst.msk [vmem:[%s2450_s7 + $0x38] sm:$0xff] %vm66_vm0, %v1308_v57 }
 0x522   :  { %1321 = vsyncpa [#allocation4], 1 }

</bundles_post_ra>
